<compile_context>
chip_gen: v7x
topology: tpu7x:2x2x1
jax: 0.10.0
libtpu: 0.0.40
codegen_flags: <defaults>
</compile_context>

<pallas_src>
from functools import partial

import jax
import jax.numpy as jnp
from jax.experimental import pallas as pl
from jax.experimental.pallas import tpu as pltpu

# ----------------------------- configuration -------------------------------
INPUT_DIM = 96        # node feature dim; member_features pyramid -> sum 96
OUTPUT_DIM = 8        # ConvolutionGGN score dim
ID_OUTPUT_DIM = 10    # stand-in for st.config[st.I]['OUTPUTDIM']
N_GCN_LAYERS = 2
PART = 3
EPS = 1e-6
DPAD = 128            # lane-dense padded feature width
SCORE_LANE = 64       # lane offset of the packed score head inside W_head


# ------------------------------ fused kernel --------------------------------
def _fused_kernel(x_ref, e0_ref, w_in_ref, b_in_ref, w_abuv_ref, w_c_ref,
                  gcn_b_ref, w_head_ref, b_head_ref, b_score_ref,
                  nodes_ref, center_ref, y_ref, id_ref, *, landmarks, graphs):
    n_layers = w_c_ref.shape[0]
    rows = x_ref.shape[0]          # 2 * graphs * landmarks (parents then children)
    half = rows // 2
    d = DPAD

    def bdot(a, w):                # bf16 operands, f32 MXU accumulation
        return jnp.dot(a.astype(jnp.bfloat16), w,
                       preferred_element_type=jnp.float32)

    def swap(t):                   # exchange parent half-rows <-> child half-rows
        return pltpu.roll(t, shift=half, axis=0)

    # input embedding (K = 96, output lane-dense 128)
    X = bdot(x_ref[...], w_in_ref[...]) + b_in_ref[...]            # (rows, 128) f32
    # edge embedding Linear(1,d)(ones) == broadcast of the precomputed row
    E = jnp.broadcast_to(e0_ref[...], (rows, d))                   # (rows, 128) f32

    gb = gcn_b_ref[...]                                            # (2L, 128) f32

    for li in range(n_layers):
        w4 = w_abuv_ref[li]        # (128, 4*128) bf16  == [A | B | U | V]
        wc = w_c_ref[li]           # (128, 128)   bf16
        be = gb[2 * li + 0:2 * li + 1]                             # (1, 128)
        bh = gb[2 * li + 1:2 * li + 2]                             # (1, 128)

        # one MXU push covers all four X-projections of this layer
        XW = bdot(X, w4)                                           # (rows, 512)
        XA = XW[:, 0 * d:1 * d]
        XB = XW[:, 1 * d:2 * d]
        XU = XW[:, 2 * d:3 * d]
        XV = XW[:, 3 * d:4 * d]

        # residual edge update (both directed edges at once)
        E = E + jnp.maximum(XA + swap(XB) + bdot(E, wc) + be, 0.0)

        # eta = sigmoid(E)/(sigmoid(E)+EPS) == 1/(1 + EPS*(1 + exp(-E)))
        eta = pl.reciprocal(1.0 + EPS * (1.0 + jnp.exp(-E)), approx=False)

        # residual node update (RHS uses pre-update X via XU/XV)
        X = X + jnp.maximum(XU + swap(eta * XV) + bh, 0.0)

    # per-graph mean over landmarks: rows = [parents(g*l); children(g*l)]
    F = jnp.mean(X.reshape(2 * graphs, landmarks, d), axis=1)      # (2g, 128)

    # single packed head matmul: lanes [0:30] id heads, [64:72] = F @ 0.5*W_score
    Gh = bdot(F, w_head_ref[...])                                  # (2g, 128)

    nodes_ref[...] = F
    center_ref[...] = 0.5 * (F[:graphs] + F[graphs:])
    y_ref[...] = Gh[:graphs] + Gh[graphs:] + b_score_ref[...]
    id_ref[...] = Gh + b_head_ref[...]


# ------------------------------ parameter init ------------------------------
def init_params(key, input_dim, output_dim):
    d = input_dim
    ks = iter(jax.random.split(key, 64))

    def mat(shape, scale):
        return (scale * jax.random.normal(next(ks), shape)).astype(jnp.float32)

    params = {
        "W_in": mat((d, d), 1.0 / jnp.sqrt(d)),
        "b_in": jnp.zeros((1, d), jnp.float32),
        "W_e": mat((1, d), 1.0),
        "b_e": jnp.zeros((1, d), jnp.float32),
        "W_score": mat((d, output_dim), 1.0 / jnp.sqrt(d)),
        "b_score": jnp.zeros((1, output_dim), jnp.float32),
        "gcn_layers": [],
        "id_W": [],
        "id_b": [],
    }
    for _ in range(N_GCN_LAYERS):
        params["gcn_layers"].append({
            "A": mat((d, d), 1.0 / jnp.sqrt(d)),
            "B": mat((d, d), 1.0 / jnp.sqrt(d)),
            "C": mat((d, d), 1.0 / jnp.sqrt(d)),
            "U": mat((d, d), 1.0 / jnp.sqrt(d)),
            "V": mat((d, d), 1.0 / jnp.sqrt(d)),
            "be": jnp.zeros((1, d), jnp.float32),
            "bh": jnp.zeros((1, d), jnp.float32),
        })

    # member feature pyramid as in the reference __init__
    member_features_list = []
    layer_size = input_dim
    while layer_size >= 32:
        member_features_list.append(layer_size)
        layer_size //= 4
    member_features_dim = sum(member_features_list)
    mlp_input_dim = member_features_dim // PART
    for _ in range(PART):
        params["id_W"].append(mat((mlp_input_dim, ID_OUTPUT_DIM),
                                  1.0 / jnp.sqrt(mlp_input_dim)))
        params["id_b"].append(jnp.zeros((1, ID_OUTPUT_DIM), jnp.float32))
    return params


def _pad2(a, rows, cols):
    return jnp.pad(a, ((0, rows - a.shape[0]), (0, cols - a.shape[1])))


def pack_params(params):
    """bf16 lane-dense weight packing (A|B|U|V fused, heads fused, 96->128 pads)."""
    d_in = params["W_in"].shape[0]                    # 96

    W_abuv = jnp.stack([
        jnp.concatenate([_pad2(lp[k], DPAD, DPAD) for k in ("A", "B", "U", "V")],
                        axis=1)
        for lp in params["gcn_layers"]])              # (L, 128, 512)
    W_c = jnp.stack([_pad2(lp["C"], DPAD, DPAD) for lp in params["gcn_layers"]])
    gcn_b = jnp.stack([_pad2(lp[k], 1, DPAD)[0]
                       for lp in params["gcn_layers"] for k in ("be", "bh")])

    # id heads: bake the stride-PART column selection of f into one weight, and
    # put 0.5*W_score into spare lanes so one matmul on F serves every head.
    mlp_in = params["id_W"][0].shape[0]               # 32
    W_head = jnp.zeros((DPAD, DPAD), jnp.float32)
    b_head = jnp.zeros((1, DPAD), jnp.float32)
    for i in range(PART):
        W_head = W_head.at[i:mlp_in * PART:PART,
                           i * ID_OUTPUT_DIM:(i + 1) * ID_OUTPUT_DIM].set(
                               params["id_W"][i])
        b_head = b_head.at[:, i * ID_OUTPUT_DIM:(i + 1) * ID_OUTPUT_DIM].set(
            params["id_b"][i])
    W_head = W_head.at[:d_in, SCORE_LANE:SCORE_LANE + OUTPUT_DIM].set(
        0.5 * params["W_score"])
    b_score_row = jnp.zeros((1, DPAD), jnp.float32).at[
        :, SCORE_LANE:SCORE_LANE + OUTPUT_DIM].set(params["b_score"][0])

    return {
        "W_in": _pad2(params["W_in"], d_in, DPAD).astype(jnp.bfloat16),  # (96,128)
        "b_in": _pad2(params["b_in"], 1, DPAD),
        # Linear(1,d) applied to ones -> single row (W_e + b_e)
        "e0": _pad2(params["W_e"] + params["b_e"], 1, DPAD),
        "W_abuv": W_abuv.astype(jnp.bfloat16),
        "W_c": W_c.astype(jnp.bfloat16),
        "gcn_b": gcn_b,
        "W_head": W_head.astype(jnp.bfloat16),
        "b_head": b_head,
        "b_score_row": b_score_row,
    }


# -------------------------------- forward -----------------------------------
def _pick_graphs_per_block(b, l, max_rows=512):
    # Cap per-block rows (v7x: 64 MiB VMEM) and leave >=2 blocks when possible
    # so both v7x TensorCores get work via dimension_semantics=("parallel",).
    cap = max(1, max_rows // (2 * l))
    if b > 1:
        cap = min(cap, b // 2)
    best = 1
    for cand in range(1, cap + 1):
        if b % cand == 0:
            best = cand
    return best


def gnn_residual_vgg_forward(packed, x1_batch, x2_batch, graphs_per_block=None):
    """Equivalent of GNN_Residual_VGG.forward (graph = create_graph_type_1)."""
    b, l, f = x1_batch.shape
    if graphs_per_block is None:
        graphs_per_block = _pick_graphs_per_block(b, l)
    g = graphs_per_block
    assert b % g == 0
    nb = b // g
    rows_per_block = 2 * g * l
    assert nb == 1 or rows_per_block % 8 == 0, "block rows must be sublane-aligned"
    L = N_GCN_LAYERS

    # per-block row layout: [parents of the block's graphs ; children of them]
    x1r = x1_batch.reshape(nb, g * l, f)
    x2r = x2_batch.reshape(nb, g * l, f)
    x = jnp.concatenate([x1r, x2r], axis=1).reshape(nb * rows_per_block, f)
    x = x.astype(jnp.float32)

    const2 = lambda j: (0, 0)
    const3 = lambda j: (0, 0, 0)

    nodes, center, y, ids = pl.pallas_call(
        partial(_fused_kernel, landmarks=l, graphs=g),
        grid=(nb,),
        in_specs=[
            pl.BlockSpec((rows_per_block, f), lambda j: (j, 0)),        # x
            pl.BlockSpec((1, DPAD), const2),                            # e0
            pl.BlockSpec((f, DPAD), const2),                            # W_in
            pl.BlockSpec((1, DPAD), const2),                            # b_in
            pl.BlockSpec((L, DPAD, 4 * DPAD), const3),                  # W_abuv
            pl.BlockSpec((L, DPAD, DPAD), const3),                      # W_c
            pl.BlockSpec((2 * L, DPAD), const2),                        # gcn_b
            pl.BlockSpec((DPAD, DPAD), const2),                         # W_head
            pl.BlockSpec((1, DPAD), const2),                            # b_head
            pl.BlockSpec((1, DPAD), const2),                            # b_score_row
        ],
        out_specs=(
            pl.BlockSpec((None, 2 * g, DPAD), lambda j: (j, 0, 0)),     # F rows
            pl.BlockSpec((None, g, DPAD), lambda j: (j, 0, 0)),         # center
            pl.BlockSpec((None, g, DPAD), lambda j: (j, 0, 0)),         # scores
            pl.BlockSpec((None, 2 * g, DPAD), lambda j: (j, 0, 0)),     # id heads
        ),
        out_shape=(
            jax.ShapeDtypeStruct((nb, 2 * g, DPAD), jnp.float32),
            jax.ShapeDtypeStruct((nb, g, DPAD), jnp.float32),
            jax.ShapeDtypeStruct((nb, g, DPAD), jnp.float32),
            jax.ShapeDtypeStruct((nb, 2 * g, DPAD), jnp.float32),
        ),
        compiler_params=pltpu.CompilerParams(
            dimension_semantics=("parallel",),
            vmem_limit_bytes=32 * 1024 * 1024,
        ),
    )(x, packed["e0"], packed["W_in"], packed["b_in"], packed["W_abuv"],
      packed["W_c"], packed["gcn_b"], packed["W_head"], packed["b_head"],
      packed["b_score_row"])

    f_parent = nodes[:, :g, :f].reshape(b, f)
    f_child = nodes[:, g:, :f].reshape(b, f)
    center_feature = center.reshape(b, DPAD)[:, :f]
    y_out = y.reshape(b, DPAD)[:, SCORE_LANE:SCORE_LANE + OUTPUT_DIM]
    ids_all = jnp.concatenate(
        [ids[:, :g, :].reshape(b, DPAD), ids[:, g:, :].reshape(b, DPAD)], axis=0)
    predict_family_id_dict = {
        i: ids_all[:, i * ID_OUTPUT_DIM:(i + 1) * ID_OUTPUT_DIM]
        for i in range(PART)
    }
    return y_out, f_parent, f_child, predict_family_id_dict, center_feature


# ------------------------- pure-JAX reference check --------------------------
def _reference_forward(params, x1_batch, x2_batch):
    """Structural reference (torch forward semantics). Matmul operands are cast
    to bf16 (f32 accumulation) to mirror the kernel's MXU numerics so the
    tolerance check stays tight; math is otherwise identical."""
    def bd(a, w):
        return jnp.dot(a.astype(jnp.bfloat16), w.astype(jnp.bfloat16),
                       preferred_element_type=jnp.float32)

    b, l, f = x1_batch.shape
    m = b * l
    hp = x1_batch.reshape(m, f).astype(jnp.float32)
    hc = x2_batch.reshape(m, f).astype(jnp.float32)
    hp = bd(hp, params["W_in"]) + params["b_in"]
    hc = bd(hc, params["W_in"]) + params["b_in"]
    e0 = jnp.ones((m, 1), jnp.float32) @ params["W_e"] + params["b_e"]
    ep, ec = e0, e0
    for lp in params["gcn_layers"]:
        ep_new = ep + jnp.maximum(bd(hp, lp["A"]) + bd(hc, lp["B"])
                                  + bd(ep, lp["C"]) + lp["be"], 0.0)
        ec_new = ec + jnp.maximum(bd(hc, lp["A"]) + bd(hp, lp["B"])
                                  + bd(ec, lp["C"]) + lp["be"], 0.0)
        sp, sc = jax.nn.sigmoid(ep_new), jax.nn.sigmoid(ec_new)
        eta_pc, eta_cp = sp / (sp + EPS), sc / (sc + EPS)
        hc_new = hc + jnp.maximum(bd(hc, lp["U"]) + eta_pc * bd(hp, lp["V"])
                                  + lp["bh"], 0.0)
        hp_new = hp + jnp.maximum(bd(hp, lp["U"]) + eta_cp * bd(hc, lp["V"])
                                  + lp["bh"], 0.0)
        hp, hc, ep, ec = hp_new, hc_new, ep_new, ec_new
    f_parent = hp.reshape(b, l, -1).mean(axis=1)
    f_child = hc.reshape(b, l, -1).mean(axis=1)
    center = 0.5 * (f_parent + f_child)
    # y = center @ W_score + b_score, written in the algebraically-equal split
    # form the kernel uses (bf16 operand rounding applied the same way).
    w_half = 0.5 * params["W_score"]
    y = bd(f_parent, w_half) + bd(f_child, w_half) + params["b_score"]
    fcat = jnp.concatenate([f_parent, f_child], axis=0)
    ids = {i: bd(fcat[:, i::PART], params["id_W"][i]) + params["id_b"][i]
           for i in range(PART)}
    return y, f_parent, f_child, ids, center


# ---------------------------------- main -------------------------------------
if __name__ == "__main__":
    key = jax.random.PRNGKey(0)
    kx1, kx2, kp = jax.random.split(key, 3)
    num_samples, num_landmarks = 2, 8
    x1 = jax.random.normal(kx1, (num_samples, num_landmarks, INPUT_DIM), jnp.float32)
    x2 = jax.random.normal(kx2, (num_samples, num_landmarks, INPUT_DIM), jnp.float32)

    params = init_params(kp, INPUT_DIM, OUTPUT_DIM)
    packed = pack_params(params)

    y, f_parent, f_child, id_dict, center = jax.block_until_ready(
        gnn_residual_vgg_forward(packed, x1, x2))

    # sanity check against the pure-JAX reference (bf16-matmul-matched numerics)
    ry, rfp, rfc, rids, rc = _reference_forward(params, x1, x2)
    TOL = dict(atol=5e-3, rtol=5e-3)
    assert jnp.allclose(f_parent, rfp, **TOL)
    assert jnp.allclose(f_child, rfc, **TOL)
    assert jnp.allclose(center, rc, **TOL)
    assert jnp.allclose(y, ry, **TOL)
    for i in range(PART):
        assert jnp.allclose(id_dict[i], rids[i], **TOL)

    assert y.shape == (num_samples, OUTPUT_DIM)
    assert f_parent.shape == (num_samples, INPUT_DIM)
    assert f_child.shape == (num_samples, INPUT_DIM)
    assert center.shape == (num_samples, INPUT_DIM)
    assert id_dict[0].shape == (2 * num_samples, ID_OUTPUT_DIM)

    print("KERNEL_OK")
</pallas_src>

<mosaic_0001>
module attributes {stable_mosaic.version = 11 : i64} {
  func.func @_fused_kernel(%arg0: i32, %arg1: memref<16x96xf32, #tpu.memory_space<vmem>>, %arg2: memref<1x128xf32, #tpu.memory_space<vmem>>, %arg3: memref<96x128xbf16, #tpu.memory_space<vmem>>, %arg4: memref<1x128xf32, #tpu.memory_space<vmem>>, %arg5: memref<2x128x512xbf16, #tpu.memory_space<vmem>>, %arg6: memref<2x128x128xbf16, #tpu.memory_space<vmem>>, %arg7: memref<4x128xf32, #tpu.memory_space<vmem>>, %arg8: memref<128x128xbf16, #tpu.memory_space<vmem>>, %arg9: memref<1x128xf32, #tpu.memory_space<vmem>>, %arg10: memref<1x128xf32, #tpu.memory_space<vmem>>, %arg11: memref<1x2x128xf32, #tpu.memory_space<vmem>>, %arg12: memref<1x1x128xf32, #tpu.memory_space<vmem>>, %arg13: memref<1x1x128xf32, #tpu.memory_space<vmem>>, %arg14: memref<1x2x128xf32, #tpu.memory_space<vmem>>) attributes {dimension_semantics = [#tpu.dimension_semantics<parallel>], iteration_bounds = array<i64: 2>, scalar_prefetch = 0 : i64, scratch_operands = 0 : i64, tpu.core_type = #tpu.core_type<tc>, window_params = [{transform_indices = @transform_0, window_bounds = array<i64: 16, 96>}, {pipeline_mode = #tpu.pipeline_mode<synchronous>, transform_indices = @transform_1, window_bounds = array<i64: 1, 128>}, {pipeline_mode = #tpu.pipeline_mode<synchronous>, transform_indices = @transform_2, window_bounds = array<i64: 96, 128>}, {pipeline_mode = #tpu.pipeline_mode<synchronous>, transform_indices = @transform_3, window_bounds = array<i64: 1, 128>}, {pipeline_mode = #tpu.pipeline_mode<synchronous>, transform_indices = @transform_4, window_bounds = array<i64: 2, 128, 512>}, {pipeline_mode = #tpu.pipeline_mode<synchronous>, transform_indices = @transform_5, window_bounds = array<i64: 2, 128, 128>}, {pipeline_mode = #tpu.pipeline_mode<synchronous>, transform_indices = @transform_6, window_bounds = array<i64: 4, 128>}, {pipeline_mode = #tpu.pipeline_mode<synchronous>, transform_indices = @transform_7, window_bounds = array<i64: 128, 128>}, {pipeline_mode = #tpu.pipeline_mode<synchronous>, transform_indices = @transform_8, window_bounds = array<i64: 1, 128>}, {pipeline_mode = #tpu.pipeline_mode<synchronous>, transform_indices = @transform_9, window_bounds = array<i64: 1, 128>}, {transform_indices = @transform_10, window_bounds = array<i64: 1, 2, 128>}, {transform_indices = @transform_11, window_bounds = array<i64: 1, 1, 128>}, {transform_indices = @transform_12, window_bounds = array<i64: 1, 1, 128>}, {transform_indices = @transform_13, window_bounds = array<i64: 1, 2, 128>}]} {
    %c0 = arith.constant 0 : index
    %c0_0 = arith.constant 0 : index
    %0 = vector.load %arg1[%c0, %c0_0] : memref<16x96xf32, #tpu.memory_space<vmem>>, vector<16x96xf32>
    %c0_1 = arith.constant 0 : index
    %c0_2 = arith.constant 0 : index
    %1 = vector.load %arg3[%c0_1, %c0_2] : memref<96x128xbf16, #tpu.memory_space<vmem>>, vector<96x128xbf16>
    %2 = arith.truncf %0 : vector<16x96xf32> to vector<16x96xbf16>
    %cst = arith.constant dense<0.000000e+00> : vector<16x128xf32>
    %3 = tpu.matmul %2, %1, %cst {dimension_numbers = #tpu.dot_dimension_numbers<[1], [0], [0], [1], [0, 0, 1, 1], [], []>} : vector<16x96xbf16>, vector<96x128xbf16>, vector<16x128xf32> -> vector<16x128xf32>
    %c0_3 = arith.constant 0 : index
    %c0_4 = arith.constant 0 : index
    %4 = vector.load %arg4[%c0_3, %c0_4] : memref<1x128xf32, #tpu.memory_space<vmem>>, vector<1x128xf32>
    %5 = vector.broadcast %4 : vector<1x128xf32> to vector<16x128xf32>
    %6 = arith.addf %3, %5 : vector<16x128xf32>
    %c0_5 = arith.constant 0 : index
    %c0_6 = arith.constant 0 : index
    %7 = vector.load %arg2[%c0_5, %c0_6] : memref<1x128xf32, #tpu.memory_space<vmem>>, vector<1x128xf32>
    %8 = vector.shape_cast %7 : vector<1x128xf32> to vector<1x128xf32>
    %9 = vector.broadcast %8 : vector<1x128xf32> to vector<16x128xf32>
    %c0_7 = arith.constant 0 : index
    %c0_8 = arith.constant 0 : index
    %10 = vector.load %arg7[%c0_7, %c0_8] : memref<4x128xf32, #tpu.memory_space<vmem>>, vector<4x128xf32>
    %c0_9 = arith.constant 0 : index
    %c0_10 = arith.constant 0 : index
    %c0_11 = arith.constant 0 : index
    %11 = vector.load %arg5[%c0_9, %c0_10, %c0_11] : memref<2x128x512xbf16, #tpu.memory_space<vmem>>, vector<1x128x512xbf16>
    %12 = vector.shape_cast %11 : vector<1x128x512xbf16> to vector<128x512xbf16>
    %c0_12 = arith.constant 0 : index
    %c0_13 = arith.constant 0 : index
    %c0_14 = arith.constant 0 : index
    %13 = vector.load %arg6[%c0_12, %c0_13, %c0_14] : memref<2x128x128xbf16, #tpu.memory_space<vmem>>, vector<1x128x128xbf16>
    %14 = vector.shape_cast %13 : vector<1x128x128xbf16> to vector<128x128xbf16>
    %15 = vector.extract_strided_slice %10 {offsets = [0, 0], sizes = [1, 128], strides = [1, 1]} : vector<4x128xf32> to vector<1x128xf32>
    %16 = vector.extract_strided_slice %10 {offsets = [1, 0], sizes = [1, 128], strides = [1, 1]} : vector<4x128xf32> to vector<1x128xf32>
    %17 = arith.truncf %6 : vector<16x128xf32> to vector<16x128xbf16>
    %cst_15 = arith.constant dense<0.000000e+00> : vector<16x512xf32>
    %18 = tpu.matmul %17, %12, %cst_15 {dimension_numbers = #tpu.dot_dimension_numbers<[1], [0], [0], [1], [0, 0, 1, 1], [], []>} : vector<16x128xbf16>, vector<128x512xbf16>, vector<16x512xf32> -> vector<16x512xf32>
    %19 = vector.extract_strided_slice %18 {offsets = [0, 0], sizes = [16, 128], strides = [1, 1]} : vector<16x512xf32> to vector<16x128xf32>
    %20 = vector.extract_strided_slice %18 {offsets = [0, 128], sizes = [16, 128], strides = [1, 1]} : vector<16x512xf32> to vector<16x128xf32>
    %21 = vector.extract_strided_slice %18 {offsets = [0, 256], sizes = [16, 128], strides = [1, 1]} : vector<16x512xf32> to vector<16x128xf32>
    %22 = vector.extract_strided_slice %18 {offsets = [0, 384], sizes = [16, 128], strides = [1, 1]} : vector<16x512xf32> to vector<16x128xf32>
    %c8_i32 = arith.constant 8 : i32
    %23 = tpu.dynamic_rotate %20 by %c8_i32 dim 0 : vector<16x128xf32>, i32 -> vector<16x128xf32>
    %24 = arith.addf %19, %23 : vector<16x128xf32>
    %25 = arith.truncf %9 : vector<16x128xf32> to vector<16x128xbf16>
    %cst_16 = arith.constant dense<0.000000e+00> : vector<16x128xf32>
    %26 = tpu.matmul %25, %14, %cst_16 {dimension_numbers = #tpu.dot_dimension_numbers<[1], [0], [0], [1], [0, 0, 1, 1], [], []>} : vector<16x128xbf16>, vector<128x128xbf16>, vector<16x128xf32> -> vector<16x128xf32>
    %27 = arith.addf %24, %26 : vector<16x128xf32>
    %28 = vector.broadcast %15 : vector<1x128xf32> to vector<16x128xf32>
    %29 = arith.addf %27, %28 : vector<16x128xf32>
    %cst_17 = arith.constant 0.000000e+00 : f32
    %30 = vector.broadcast %cst_17 : f32 to vector<16x128xf32>
    %31 = arith.maximumf %29, %30 : vector<16x128xf32>
    %32 = arith.addf %9, %31 : vector<16x128xf32>
    %cst_18 = arith.constant 0.000000e+00 : f32
    %33 = vector.broadcast %cst_18 : f32 to vector<16x128xf32>
    %34 = arith.subf %33, %32 : vector<16x128xf32>
    %35 = math.exp %34 : vector<16x128xf32>
    %cst_19 = arith.constant 1.000000e+00 : f32
    %36 = vector.broadcast %cst_19 : f32 to vector<16x128xf32>
    %37 = arith.addf %36, %35 : vector<16x128xf32>
    %cst_20 = arith.constant 9.99999997E-7 : f32
    %38 = vector.broadcast %cst_20 : f32 to vector<16x128xf32>
    %39 = arith.mulf %38, %37 : vector<16x128xf32>
    %cst_21 = arith.constant 1.000000e+00 : f32
    %40 = vector.broadcast %cst_21 : f32 to vector<16x128xf32>
    %41 = arith.addf %40, %39 : vector<16x128xf32>
    %42 = tpu.reciprocal %41 : vector<16x128xf32> -> vector<16x128xf32>
    %43 = arith.mulf %42, %22 : vector<16x128xf32>
    %c8_i32_22 = arith.constant 8 : i32
    %44 = tpu.dynamic_rotate %43 by %c8_i32_22 dim 0 : vector<16x128xf32>, i32 -> vector<16x128xf32>
    %45 = arith.addf %21, %44 : vector<16x128xf32>
    %46 = vector.broadcast %16 : vector<1x128xf32> to vector<16x128xf32>
    %47 = arith.addf %45, %46 : vector<16x128xf32>
    %cst_23 = arith.constant 0.000000e+00 : f32
    %48 = vector.broadcast %cst_23 : f32 to vector<16x128xf32>
    %49 = arith.maximumf %47, %48 : vector<16x128xf32>
    %50 = arith.addf %6, %49 : vector<16x128xf32>
    %c1 = arith.constant 1 : index
    %c0_24 = arith.constant 0 : index
    %c0_25 = arith.constant 0 : index
    %51 = vector.load %arg5[%c1, %c0_24, %c0_25] : memref<2x128x512xbf16, #tpu.memory_space<vmem>>, vector<1x128x512xbf16>
    %52 = vector.shape_cast %51 : vector<1x128x512xbf16> to vector<128x512xbf16>
    %c1_26 = arith.constant 1 : index
    %c0_27 = arith.constant 0 : index
    %c0_28 = arith.constant 0 : index
    %53 = vector.load %arg6[%c1_26, %c0_27, %c0_28] : memref<2x128x128xbf16, #tpu.memory_space<vmem>>, vector<1x128x128xbf16>
    %54 = vector.shape_cast %53 : vector<1x128x128xbf16> to vector<128x128xbf16>
    %55 = vector.extract_strided_slice %10 {offsets = [2, 0], sizes = [1, 128], strides = [1, 1]} : vector<4x128xf32> to vector<1x128xf32>
    %56 = vector.extract_strided_slice %10 {offsets = [3, 0], sizes = [1, 128], strides = [1, 1]} : vector<4x128xf32> to vector<1x128xf32>
    %57 = arith.truncf %50 : vector<16x128xf32> to vector<16x128xbf16>
    %cst_29 = arith.constant dense<0.000000e+00> : vector<16x512xf32>
    %58 = tpu.matmul %57, %52, %cst_29 {dimension_numbers = #tpu.dot_dimension_numbers<[1], [0], [0], [1], [0, 0, 1, 1], [], []>} : vector<16x128xbf16>, vector<128x512xbf16>, vector<16x512xf32> -> vector<16x512xf32>
    %59 = vector.extract_strided_slice %58 {offsets = [0, 0], sizes = [16, 128], strides = [1, 1]} : vector<16x512xf32> to vector<16x128xf32>
    %60 = vector.extract_strided_slice %58 {offsets = [0, 128], sizes = [16, 128], strides = [1, 1]} : vector<16x512xf32> to vector<16x128xf32>
    %61 = vector.extract_strided_slice %58 {offsets = [0, 256], sizes = [16, 128], strides = [1, 1]} : vector<16x512xf32> to vector<16x128xf32>
    %62 = vector.extract_strided_slice %58 {offsets = [0, 384], sizes = [16, 128], strides = [1, 1]} : vector<16x512xf32> to vector<16x128xf32>
    %c8_i32_30 = arith.constant 8 : i32
    %63 = tpu.dynamic_rotate %60 by %c8_i32_30 dim 0 : vector<16x128xf32>, i32 -> vector<16x128xf32>
    %64 = arith.addf %59, %63 : vector<16x128xf32>
    %65 = arith.truncf %32 : vector<16x128xf32> to vector<16x128xbf16>
    %cst_31 = arith.constant dense<0.000000e+00> : vector<16x128xf32>
    %66 = tpu.matmul %65, %54, %cst_31 {dimension_numbers = #tpu.dot_dimension_numbers<[1], [0], [0], [1], [0, 0, 1, 1], [], []>} : vector<16x128xbf16>, vector<128x128xbf16>, vector<16x128xf32> -> vector<16x128xf32>
    %67 = arith.addf %64, %66 : vector<16x128xf32>
    %68 = vector.broadcast %55 : vector<1x128xf32> to vector<16x128xf32>
    %69 = arith.addf %67, %68 : vector<16x128xf32>
    %cst_32 = arith.constant 0.000000e+00 : f32
    %70 = vector.broadcast %cst_32 : f32 to vector<16x128xf32>
    %71 = arith.maximumf %69, %70 : vector<16x128xf32>
    %72 = arith.addf %32, %71 : vector<16x128xf32>
    %cst_33 = arith.constant 0.000000e+00 : f32
    %73 = vector.broadcast %cst_33 : f32 to vector<16x128xf32>
    %74 = arith.subf %73, %72 : vector<16x128xf32>
    %75 = math.exp %74 : vector<16x128xf32>
    %cst_34 = arith.constant 1.000000e+00 : f32
    %76 = vector.broadcast %cst_34 : f32 to vector<16x128xf32>
    %77 = arith.addf %76, %75 : vector<16x128xf32>
    %cst_35 = arith.constant 9.99999997E-7 : f32
    %78 = vector.broadcast %cst_35 : f32 to vector<16x128xf32>
    %79 = arith.mulf %78, %77 : vector<16x128xf32>
    %cst_36 = arith.constant 1.000000e+00 : f32
    %80 = vector.broadcast %cst_36 : f32 to vector<16x128xf32>
    %81 = arith.addf %80, %79 : vector<16x128xf32>
    %82 = tpu.reciprocal %81 : vector<16x128xf32> -> vector<16x128xf32>
    %83 = arith.mulf %82, %62 : vector<16x128xf32>
    %c8_i32_37 = arith.constant 8 : i32
    %84 = tpu.dynamic_rotate %83 by %c8_i32_37 dim 0 : vector<16x128xf32>, i32 -> vector<16x128xf32>
    %85 = arith.addf %61, %84 : vector<16x128xf32>
    %86 = vector.broadcast %56 : vector<1x128xf32> to vector<16x128xf32>
    %87 = arith.addf %85, %86 : vector<16x128xf32>
    %cst_38 = arith.constant 0.000000e+00 : f32
    %88 = vector.broadcast %cst_38 : f32 to vector<16x128xf32>
    %89 = arith.maximumf %87, %88 : vector<16x128xf32>
    %90 = arith.addf %50, %89 : vector<16x128xf32>
    %91 = vector.shape_cast %90 : vector<16x128xf32> to vector<2x8x128xf32>
    %cst_39 = arith.constant dense<0.000000e+00> : vector<2x128xf32>
    %92 = vector.multi_reduction <add>, %91, %cst_39 [1] : vector<2x8x128xf32> to vector<2x128xf32>
    %cst_40 = arith.constant 8.000000e+00 : f32
    %93 = vector.broadcast %cst_40 : f32 to vector<2x128xf32>
    %94 = arith.divf %92, %93 : vector<2x128xf32>
    %c0_41 = arith.constant 0 : index
    %c0_42 = arith.constant 0 : index
    %95 = vector.load %arg8[%c0_41, %c0_42] : memref<128x128xbf16, #tpu.memory_space<vmem>>, vector<128x128xbf16>
    %96 = arith.truncf %94 : vector<2x128xf32> to vector<2x128xbf16>
    %cst_43 = arith.constant dense<0.000000e+00> : vector<2x128xf32>
    %97 = tpu.matmul %96, %95, %cst_43 {dimension_numbers = #tpu.dot_dimension_numbers<[1], [0], [0], [1], [0, 0, 1, 1], [], []>} : vector<2x128xbf16>, vector<128x128xbf16>, vector<2x128xf32> -> vector<2x128xf32>
    %c0_44 = arith.constant 0 : index
    %c0_45 = arith.constant 0 : index
    %c0_46 = arith.constant 0 : index
    %98 = vector.load %arg11[%c0_44, %c0_45, %c0_46] : memref<1x2x128xf32, #tpu.memory_space<vmem>>, vector<1x2x128xf32>
    %99 = vector.shape_cast %98 : vector<1x2x128xf32> to vector<2x128xf32>
    %100 = vector.shape_cast %94 : vector<2x128xf32> to vector<1x2x128xf32>
    tpu.vector_store %arg11[%c0_44, %c0_45, %c0_46], %100 {strides = array<i32>} : memref<1x2x128xf32, #tpu.memory_space<vmem>>, vector<1x2x128xf32>,
    %101 = vector.extract_strided_slice %94 {offsets = [0, 0], sizes = [1, 128], strides = [1, 1]} : vector<2x128xf32> to vector<1x128xf32>
    %102 = vector.extract_strided_slice %94 {offsets = [1, 0], sizes = [1, 128], strides = [1, 1]} : vector<2x128xf32> to vector<1x128xf32>
    %103 = arith.addf %101, %102 : vector<1x128xf32>
    %cst_47 = arith.constant 5.000000e-01 : f32
    %104 = vector.broadcast %cst_47 : f32 to vector<1x128xf32>
    %105 = arith.mulf %104, %103 : vector<1x128xf32>
    %c0_48 = arith.constant 0 : index
    %c0_49 = arith.constant 0 : index
    %c0_50 = arith.constant 0 : index
    %106 = vector.load %arg12[%c0_48, %c0_49, %c0_50] : memref<1x1x128xf32, #tpu.memory_space<vmem>>, vector<1x1x128xf32>
    %107 = vector.shape_cast %106 : vector<1x1x128xf32> to vector<1x128xf32>
    %108 = vector.shape_cast %105 : vector<1x128xf32> to vector<1x1x128xf32>
    tpu.vector_store %arg12[%c0_48, %c0_49, %c0_50], %108 {strides = array<i32>} : memref<1x1x128xf32, #tpu.memory_space<vmem>>, vector<1x1x128xf32>,
    %109 = vector.extract_strided_slice %97 {offsets = [0, 0], sizes = [1, 128], strides = [1, 1]} : vector<2x128xf32> to vector<1x128xf32>
    %110 = vector.extract_strided_slice %97 {offsets = [1, 0], sizes = [1, 128], strides = [1, 1]} : vector<2x128xf32> to vector<1x128xf32>
    %111 = arith.addf %109, %110 : vector<1x128xf32>
    %c0_51 = arith.constant 0 : index
    %c0_52 = arith.constant 0 : index
    %112 = vector.load %arg10[%c0_51, %c0_52] : memref<1x128xf32, #tpu.memory_space<vmem>>, vector<1x128xf32>
    %113 = arith.addf %111, %112 : vector<1x128xf32>
    %c0_53 = arith.constant 0 : index
    %c0_54 = arith.constant 0 : index
    %c0_55 = arith.constant 0 : index
    %114 = vector.load %arg13[%c0_53, %c0_54, %c0_55] : memref<1x1x128xf32, #tpu.memory_space<vmem>>, vector<1x1x128xf32>
    %115 = vector.shape_cast %114 : vector<1x1x128xf32> to vector<1x128xf32>
    %116 = vector.shape_cast %113 : vector<1x128xf32> to vector<1x1x128xf32>
    tpu.vector_store %arg13[%c0_53, %c0_54, %c0_55], %116 {strides = array<i32>} : memref<1x1x128xf32, #tpu.memory_space<vmem>>, vector<1x1x128xf32>,
    %c0_56 = arith.constant 0 : index
    %c0_57 = arith.constant 0 : index
    %117 = vector.load %arg9[%c0_56, %c0_57] : memref<1x128xf32, #tpu.memory_space<vmem>>, vector<1x128xf32>
    %118 = vector.broadcast %117 : vector<1x128xf32> to vector<2x128xf32>
    %119 = arith.addf %97, %118 : vector<2x128xf32>
    %c0_58 = arith.constant 0 : index
    %c0_59 = arith.constant 0 : index
    %c0_60 = arith.constant 0 : index
    %120 = vector.load %arg14[%c0_58, %c0_59, %c0_60] : memref<1x2x128xf32, #tpu.memory_space<vmem>>, vector<1x2x128xf32>
    %121 = vector.shape_cast %120 : vector<1x2x128xf32> to vector<2x128xf32>
    %122 = vector.shape_cast %119 : vector<2x128xf32> to vector<1x2x128xf32>
    tpu.vector_store %arg14[%c0_58, %c0_59, %c0_60], %122 {strides = array<i32>} : memref<1x2x128xf32, #tpu.memory_space<vmem>>, vector<1x2x128xf32>,
    return
  }
  func.func @transform_0(%arg0: i32) -> (i32, i32) {
    %c0_i32 = arith.constant 0 : i32
    %c0_i32_0 = arith.constant 0 : i32
    return %arg0, %c0_i32 : i32, i32
  }
  func.func @transform_1(%arg0: i32) -> (i32, i32) {
    %c0_i32 = arith.constant 0 : i32
    %c0_i32_0 = arith.constant 0 : i32
    %c0_i32_1 = arith.constant 0 : i32
    return %c0_i32, %c0_i32_0 : i32, i32
  }
  func.func @transform_2(%arg0: i32) -> (i32, i32) {
    %c0_i32 = arith.constant 0 : i32
    %c0_i32_0 = arith.constant 0 : i32
    %c0_i32_1 = arith.constant 0 : i32
    return %c0_i32, %c0_i32_0 : i32, i32
  }
  func.func @transform_3(%arg0: i32) -> (i32, i32) {
    %c0_i32 = arith.constant 0 : i32
    %c0_i32_0 = arith.constant 0 : i32
    %c0_i32_1 = arith.constant 0 : i32
    return %c0_i32, %c0_i32_0 : i32, i32
  }
  func.func @transform_4(%arg0: i32) -> (i32, i32, i32) {
    %c0_i32 = arith.constant 0 : i32
    %c0_i32_0 = arith.constant 0 : i32
    %c0_i32_1 = arith.constant 0 : i32
    %c0_i32_2 = arith.constant 0 : i32
    return %c0_i32, %c0_i32_0, %c0_i32_1 : i32, i32, i32
  }
  func.func @transform_5(%arg0: i32) -> (i32, i32, i32) {
    %c0_i32 = arith.constant 0 : i32
    %c0_i32_0 = arith.constant 0 : i32
    %c0_i32_1 = arith.constant 0 : i32
    %c0_i32_2 = arith.constant 0 : i32
    return %c0_i32, %c0_i32_0, %c0_i32_1 : i32, i32, i32
  }
  func.func @transform_6(%arg0: i32) -> (i32, i32) {
    %c0_i32 = arith.constant 0 : i32
    %c0_i32_0 = arith.constant 0 : i32
    %c0_i32_1 = arith.constant 0 : i32
    return %c0_i32, %c0_i32_0 : i32, i32
  }
  func.func @transform_7(%arg0: i32) -> (i32, i32) {
    %c0_i32 = arith.constant 0 : i32
    %c0_i32_0 = arith.constant 0 : i32
    %c0_i32_1 = arith.constant 0 : i32
    return %c0_i32, %c0_i32_0 : i32, i32
  }
  func.func @transform_8(%arg0: i32) -> (i32, i32) {
    %c0_i32 = arith.constant 0 : i32
    %c0_i32_0 = arith.constant 0 : i32
    %c0_i32_1 = arith.constant 0 : i32
    return %c0_i32, %c0_i32_0 : i32, i32
  }
  func.func @transform_9(%arg0: i32) -> (i32, i32) {
    %c0_i32 = arith.constant 0 : i32
    %c0_i32_0 = arith.constant 0 : i32
    %c0_i32_1 = arith.constant 0 : i32
    return %c0_i32, %c0_i32_0 : i32, i32
  }
  func.func @transform_10(%arg0: i32) -> (i32, i32, i32) {
    %c0_i32 = arith.constant 0 : i32
    %c0_i32_0 = arith.constant 0 : i32
    %c0_i32_1 = arith.constant 0 : i32
    return %arg0, %c0_i32, %c0_i32_0 : i32, i32, i32
  }
  func.func @transform_11(%arg0: i32) -> (i32, i32, i32) {
    %c0_i32 = arith.constant 0 : i32
    %c0_i32_0 = arith.constant 0 : i32
    %c0_i32_1 = arith.constant 0 : i32
    return %arg0, %c0_i32, %c0_i32_0 : i32, i32, i32
  }
  func.func @transform_12(%arg0: i32) -> (i32, i32, i32) {
    %c0_i32 = arith.constant 0 : i32
    %c0_i32_0 = arith.constant 0 : i32
    %c0_i32_1 = arith.constant 0 : i32
    return %arg0, %c0_i32, %c0_i32_0 : i32, i32, i32
  }
  func.func @transform_13(%arg0: i32) -> (i32, i32, i32) {
    %c0_i32 = arith.constant 0 : i32
    %c0_i32_0 = arith.constant 0 : i32
    %c0_i32_1 = arith.constant 0 : i32
    return %arg0, %c0_i32, %c0_i32_0 : i32, i32, i32
  }
}

</mosaic_0001>

<bundles_post_ra>
// kernel: tpu_custom_call.1
= control target key start
LH: loop header
LB: loop body
LE: loop exit
PB: predicated region body
PF: predicated region fallthrough
CT: control target
= control target key end

     0   :  { %s3298_s0 = inlined_call_operand.hbm [shape: f32[32,96], index: 0, kind: input, shape index: {}]   ;;  %s3299_s1 = inlined_call_operand.vmem [shape: f32[1,128], index: 1, kind: input, shape index: {}]   ;;  %s3300_s2 = inlined_call_operand.hbm [shape: bf16[96,128], index: 2, kind: input, shape index: {}]   ;;  %s3301_s3 = inlined_call_operand.vmem [shape: f32[1,128], index: 3, kind: input, shape index: {}]   ;;  %s3302_s4 = inlined_call_operand.hbm [shape: bf16[2,128,512], index: 4, kind: input, shape index: {}]   ;;  %s3303_s5 = inlined_call_operand.hbm [shape: bf16[2,128,128], index: 5, kind: input, shape index: {}]   ;;  %s3304_s6 = inlined_call_operand.vmem [shape: f32[4,128], index: 6, kind: input, shape index: {}]   ;;  %s3305_s7 = inlined_call_operand.hbm [shape: bf16[128,128], index: 7, kind: input, shape index: {}]   ;;  %s3306_s8 = inlined_call_operand.vmem [shape: f32[1,128], index: 8, kind: input, shape index: {}]   ;;  %s3307_s9 = inlined_call_operand.vmem [shape: f32[1,128], index: 9, kind: input, shape index: {}]   ;;  %s3308_s10 = inlined_call_operand.hbm [shape: f32[2,2,128], index: 10, kind: output, shape index: {0}]   ;;  %s3309_s11 = inlined_call_operand.hbm [shape: f32[2,1,128], index: 11, kind: output, shape index: {1}]   ;;  %s3310_s12 = inlined_call_operand.hbm [shape: f32[2,1,128], index: 12, kind: output, shape index: {2}]   ;;  %s3311_s13 = inlined_call_operand.hbm [shape: f32[2,2,128], index: 13, kind: output, shape index: {3}]  }
   0x1   :  { %3326 = sst [smem:[#allocation25_spill]] %s3298_s0 }
   0x2   :  { %3327 = sst [smem:[#allocation26_spill]] %s3299_s1 }
   0x3   :  { %3328 = sst [smem:[#allocation27_spill]] %s3300_s2 }
   0x4   :  { %3329 = sst [smem:[#allocation28_spill]] %s3306_s8 }
   0x5   :  { %3330 = sst [smem:[#allocation29_spill]] %s3307_s9 }
   0x6   :  { %3331 = sst [smem:[#allocation30_spill]] %s3308_s10 }
   0x7   :  { %3332 = sst [smem:[#allocation31_spill]] %s3310_s12 }
   0x8   :  { %3333 = sst [smem:[#allocation32_spill]] %s3311_s13 }
   0x9   :  { %19 = vsyncpa [#allocation3], 0 }
   0xa   :  { %21 = vsyncpa [#allocation3 + $0x1], 0 }
   0xb   :  { %22 = vsyncpa [#allocation6], 0 }
   0xc   :  { %23 = vsyncpa [#allocation9], 0 }
   0xd   :  { %24 = vsyncpa [#allocation4], 0 }
   0xe   :  { %26 = vsyncpa [#allocation4 + $0x1], 0 }
   0xf   :  { %27 = vsyncpa [#allocation13], 0 }
  0x10   :  { %29 = vsyncpa [#allocation13 + $0x1], 0 }
  0x11   :  { %30 = vsyncpa [#allocation16], 0 }
  0x12   :  { %32 = vsyncpa [#allocation16 + $0x1], 0  ;;  %s2810_s25 = smov 0   ;;  %s2812_s26 = smov 0  }
  0x13   :  { %s2814_s27 = smov 0   ;;  %s2816_s28 = smov 0  }
  0x14 LB: > { %3334 = sst [smem:[#allocation23_spill]] %s2708_s25  ;;  %s2831_s29 = sadd.s32 4294967295, %s2720_s28   ;;  %s2720_s28 = sphi %s2816_s28, %s3372_s28   ;;  %s2716_s27 = sphi %s2814_s27, %s3371_s27   ;;  %s2712_s26 = sphi %s2812_s26, %s3370_s26   ;;  %s2708_s25 = sphi %s2810_s25, %s3369_s25  }
  0x15   : > { %s3312_s30 = sadd.s32 4294967294, %s2720_s28   ;;  %p58_p0 = scmp.ne.s32.totalorder %s2712_s26, %s2708_s25 }
  0x16   : > { %p3316_p1 = scmp.eq.s32.totalorder %s2831_s29, 0  ;;  %p277_p3 = scmp.eq.s32.totalorder %s3312_s30, 1 }
  0x17   : > { %p1925_p5 = scmp.ge.s32.totalorder %s2720_s28, 1  ;;  %p362_p7 = scmp.lt.s32.totalorder %s2720_s28, 3 }
  0x18   : > { %p2842_p4 = por %p3316_p1, %p58_p0  ;;  %p2847_p6 = por %p277_p3, %p58_p0 }
  0x19   : > { %p2852_p8 = pnand %p1925_p5, %p362_p7  ;;  %s2722_s17 = smov [#allocation5]  }
  0x1a   : > { %s3335_s14 = scalar_select %p2842_p4, 1, 0 }
  0x1b   : > { %s3336_s15 = scalar_select %p2847_p6, 1, 0 }
  0x1c   : > { %s3338_s16 = scalar_select %p2852_p8, 1, 0 }
  0x1d   : > { %3337 = sst [smem:[#allocation24_spill]] %s3336_s15  ;;  %s377_s18 = sshll.u32 %s2722_s17, 4  ;;  %s2856_s18 = int_to_ptr.vmem [resolvable:$true] %s377_s18 }
  0x1e   : > { %p2185_p9 = pneg %p2852_p8  ;;  %s2723_s20 = smov [#allocation8]  }
  0x1f   : > { %s406_s21 = sshll.u32 %s2723_s20, 4  ;;  %s2724_s22 = smov [#allocation7]   ;;  %s2867_s21 = int_to_ptr.vmem [resolvable:$true] %s406_s21 }
  0x20   : > { %p2863_p11 = pnand %p2185_p9, %p3316_p1  ;;  %s2869_s23 = sshll.u32 %s2724_s22, 4  ;;  %s394_s23 = int_to_ptr.vmem [resolvable:$true] %s2869_s23 }
  0x21   : > { %s3340_s2 = sld [smem:[#allocation27_spill]] }
  0x22   : > { %p2879_p13 = pneg %p2863_p11 }
  0x27   : > { %s2412_s30 = scalar_lea.hbm %s3340_s2, 768 }
  0x28   : > { %p2413_p12 = scmp.ne.s32.totalorder %s3340_s2, %s2412_s30  ;;  %p2419_p5 = scmp.lt.u32.totalorder %s2412_s30, %s3340_s2 }
  0x2a   : > { %p2415_p0 = pnand %p2879_p13, %p2413_p12 }
  0x2c   : > { %p2416_p3 = pneg %p2415_p0 }
  0x2e   : > { %p2421_p7 = pnand %p2419_p5, %p2416_p3 }
  0x30   : > { %2424 = shalt.err (!%p2421_p7)
}
  0x31   : > { %s2425_s25 = scalar_lea.vmem %s2856_s18, 768  ;;  %p2433_p2 = scmp.lt.s32.totalorder %s2856_s18, %s2856_s18 }
  0x32   : > { %p2426_p9 = scmp.ne.s32.totalorder %s2856_s18, %s2425_s25  ;;  %p2434_p6 = scmp.lt.s32.totalorder %s2425_s25, %s2425_s25 }
  0x34   : > { %p2428_p10 = pnand %p2426_p9, %p2879_p13  ;;  %p2435_p12 = por %p2434_p6, %p2433_p2 }
  0x36   : > { %p2429_p1 = pneg %p2428_p10 }
  0x38   : > { %p2436_p0 = pnand %p2435_p12, %p2429_p1 }
  0x3a   : > { %2439 = shalt.err (!%p2436_p0)
}
  0x3b   : > { %s3321_s15 = smov 64   ;;  %s3322_s30 = smov 4  }
  0x3c   : > { %2188 = dma.hbm_to_vmem [thread:$0]  (!%p2863_p11), %s3340_s2, 768, %s2856_s18, [#allocation6], %s3321_s15, %s3321_s15, %s3322_s30  }
  0x3d   : > { %s2440_s25 = scalar_lea.hbm %s3303_s5, 2048 }
  0x3e   : > { %p2441_p1 = scmp.ne.s32.totalorder %s3303_s5, %s2440_s25  ;;  %p2447_p10 = scmp.lt.u32.totalorder %s2440_s25, %s3303_s5 }
  0x40   : > { %p2443_p2 = pnand %p2441_p1, %p2879_p13 }
  0x42   : > { %p2444_p6 = pneg %p2443_p2 }
  0x44   : > { %p2449_p3 = pnand %p2447_p10, %p2444_p6 }
  0x46   : > { %2452 = shalt.err (!%p2449_p3)
}
  0x47   : > { %s2453_s18 = scalar_lea.vmem %s2867_s21, 2048  ;;  %p2461_p12 = scmp.lt.s32.totalorder %s2867_s21, %s2867_s21 }
  0x48   : > { %p2454_p5 = scmp.ne.s32.totalorder %s2867_s21, %s2453_s18  ;;  %p2462_p0 = scmp.lt.s32.totalorder %s2453_s18, %s2453_s18 }
  0x4a   : > { %p2456_p7 = pnand %p2454_p5, %p2879_p13  ;;  %p2463_p1 = por %p2462_p0, %p2461_p12 }
  0x4c   : > { %p2457_p9 = pneg %p2456_p7 }
  0x4e   : > { %p2464_p2 = pnand %p2463_p1, %p2457_p9 }
  0x50   : > { %2467 = shalt.err (!%p2464_p2)
}
  0x51   : > { %2194 = dma.hbm_to_vmem [thread:$0]  (!%p2863_p11), %s3303_s5, 2048, %s2867_s21, [#allocation9], %s3321_s15, %s3321_s15, %s3322_s30  }
  0x52   : > { %s2468_s24 = scalar_lea.hbm %s3302_s4, 8192 }
  0x53   : > { %p2469_p6 = scmp.ne.s32.totalorder %s3302_s4, %s2468_s24  ;;  %p2475_p5 = scmp.lt.u32.totalorder %s2468_s24, %s3302_s4 }
  0x55   : > { %p2471_p10 = pnand %p2469_p6, %p2879_p13 }
  0x57   : > { %p2472_p3 = pneg %p2471_p10 }
  0x59   : > { %p2477_p7 = pnand %p2475_p5, %p2472_p3 }
  0x5b   : > { %2480 = shalt.err (!%p2477_p7)
}
  0x5c   : > { %s2481_s18 = scalar_lea.vmem %s394_s23, 8192  ;;  %p2489_p1 = scmp.lt.s32.totalorder %s394_s23, %s394_s23 }
  0x5d   : > { %p2482_p9 = scmp.ne.s32.totalorder %s394_s23, %s2481_s18  ;;  %p2490_p2 = scmp.lt.s32.totalorder %s2481_s18, %s2481_s18 }
  0x5f   : > { %p2484_p12 = pnand %p2482_p9, %p2879_p13  ;;  %p2491_p4 = por %p2490_p2, %p2489_p1 }
  0x61   : > { %p2485_p0 = pneg %p2484_p12 }
  0x63   : > { %p2492_p8 = pnand %p2491_p4, %p2485_p0 }
  0x65   : > { %2495 = shalt.err (!%p2492_p8)
}
  0x66   : > { %s2727_s21 = smov 256   ;;  %s2728_s8 = smov 16  }
  0x67   : > { %2191 = dma.hbm_to_vmem [thread:$0]  (!%p2863_p11), %s3302_s4, 8192, %s394_s23, [#allocation6], %s2727_s21, %s2727_s21, %s2728_s8  }
  0x68   : > { %s2729_s13 = smov [#allocation10]   ;;  %s2496_s22 = scalar_lea.hbm %s3305_s7, 1024 }
  0x69   : > { %s422_s24 = sshll.u32 %s2729_s13, 4  ;;  %p2497_p4 = scmp.ne.s32.totalorder %s3305_s7, %s2496_s22  ;;  %s423_s24 = int_to_ptr.vmem [resolvable:$true] %s422_s24 }
  0x6a   : > { %p2503_p10 = scmp.lt.u32.totalorder %s2496_s22, %s3305_s7 }
  0x6b   : > { %p2499_p8 = pnand %p2497_p4, %p2879_p13 }
  0x6d   : > { %p2500_p6 = pneg %p2499_p8 }
  0x6f   : > { %p2505_p3 = pnand %p2503_p10, %p2500_p6 }
  0x71   : > { %2508 = shalt.err (!%p2505_p3)
}
  0x72   : > { %s2509_s23 = scalar_lea.vmem %s423_s24, 1024  ;;  %p2517_p12 = scmp.lt.s32.totalorder %s423_s24, %s423_s24 }
  0x73   : > { %p2510_p5 = scmp.ne.s32.totalorder %s423_s24, %s2509_s23  ;;  %p2518_p0 = scmp.lt.s32.totalorder %s2509_s23, %s2509_s23 }
  0x75   : > { %p2512_p7 = pnand %p2510_p5, %p2879_p13  ;;  %p2519_p1 = por %p2518_p0, %p2517_p12 }
  0x77   : > { %p2513_p9 = pneg %p2512_p7 }
  0x79   : > { %p2520_p2 = pnand %p2519_p1, %p2513_p9 }
  0x7b   : > { %2523 = shalt.err (!%p2520_p2)
}
  0x7c   : > { %s3342_s21 = smov 4   ;;  %s3343_s8 = smov 64  }
  0x7d   : > { %2197 = dma.hbm_to_vmem [thread:$0]  (!%p2863_p11), %s3305_s7, 1024, %s423_s24, [#allocation9], %s3343_s8, %s3343_s8, %s3342_s21  }
  0x7e   : > { %s2970_s12 = sadd.s32 1, %s2720_s28   ;;  %s45_s19 = sadd.s32 1, %s2716_s27 }
  0x7f   : > { %s42_s9 = ssub.s32 %s2720_s28, %s2970_s12  ;;  %p52_p13 = scmp.ne.s32.totalorder %s2716_s27, %s2712_s26 }
  0x80   : > { %p43_p4 = scmp.eq.s32.totalorder %s42_s9, 0  ;;  %p53_p8 = scmp.eq.s32.totalorder %s2720_s28, 0 }
  0x81   : > { %p3344_p6 = scmp.eq.s32.totalorder %s2831_s29, 1  ;;  %p2219_p3 = scmp.lt.s32.totalorder %s2720_s28, 2 }
  0x82   : > { %s2986_s13 = scalar_select %p43_p4, %s2716_s27, %s45_s19  }
  0x83   : > { %p2980_p10 = por %p3344_p6, %p52_p13  ;;  %p54_p5 = por %p53_p8, %p52_p13 }
  0x84   : > { %s442_s17 = sand.u32 1, %s2716_s27   ;;  %s2048_s24 = sshll.u32 %s2720_s28, 8 }
  0x85   : > { %s1931_s20 = sshll.u32 %s442_s17, 4  ;;  %s3346_s0 = sld [smem:[#allocation25_spill]] }
  0x86   : > { %s446_s23 = scalar_lea.vmem [#allocation2], %s1931_s20  ;;  %p2997_p11 = pnand %p2219_p3, %p54_p5 }
  0x87   : > { %s453_s21 = sshll.u32 %s446_s23, 4  ;;  %s3001_s15 = scalar_lea.sflag [#allocation3], %s442_s17  ;;  %s2995_s21 = int_to_ptr.vmem [resolvable:$true] %s453_s21 }
  0x88   : > { %p2526_p9 = pneg %p2997_p11 }
  0x8b   : > { %s2993_s18 = scalar_lea.hbm %s3346_s0, %s2048_s24  ;;  %s2529_s20 = scalar_lea.hbm %s3346_s0, 512 }
  0x8c   : > { %s2524_s30 = scalar_lea.hbm %s2993_s18, 256  ;;  %p2530_p1 = scmp.lt.u32.totalorder %s2993_s18, %s3346_s0 }
  0x8d   : > { %p2525_p7 = scmp.ne.s32.totalorder %s2993_s18, %s2524_s30  ;;  %p2531_p2 = scmp.lt.u32.totalorder %s2529_s20, %s2524_s30 }
  0x8e   : > { %p2533_p4 = scmp.lt.u32.totalorder %s2524_s30, %s2993_s18 }
  0x8f   : > { %p2527_p12 = pnand %p2526_p9, %p2525_p7  ;;  %p2532_p13 = por %p2531_p2, %p2530_p1 }
  0x91   : > { %p2528_p0 = pneg %p2527_p12  ;;  %p2534_p8 = por %p2533_p4, %p2532_p13 }
  0x93   : > { %p2535_p6 = pnand %p2534_p8, %p2528_p0 }
  0x95   : > { %2538 = shalt.err (!%p2535_p6)
}
  0x96   : > { %s2539_s17 = scalar_lea.vmem %s2995_s21, 256  ;;  %s2730_s25 = smov [#allocation2]  }
  0x97   : > { %p2540_p3 = scmp.ne.s32.totalorder %s2995_s21, %s2539_s17  ;;  %s2544_s23 = sshll.u32 %s2730_s25, 4  ;;  %s2545_s23 = int_to_ptr.vmem [resolvable:$false] %s2544_s23 }
  0x98   : > { %s2546_s19 = scalar_lea.vmem %s2545_s23, 512  ;;  %p2547_p12 = scmp.lt.s32.totalorder %s2995_s21, %s2545_s23 }
  0x99   : > { %p2542_p5 = pnand %p2540_p3, %p2526_p9  ;;  %p2548_p1 = scmp.lt.s32.totalorder %s2546_s19, %s2539_s17 }
  0x9b   : > { %p2543_p7 = pneg %p2542_p5  ;;  %p2549_p2 = por %p2548_p1, %p2547_p12 }
  0x9d   : > { %p2550_p13 = pnand %p2549_p2, %p2543_p7 }
  0x9f   : > { %2553 = shalt.err (!%p2550_p13)
}
  0xa0   : > { %s2731_s30 = smov 128   ;;  %s2732_s9 = smov 8  }
  0xa1   : > { %2201 = dma.hbm_to_vmem [thread:$0]  (!%p2997_p11), %s2993_s18, 256, %s2995_s21, %s3001_s15, %s2731_s30, %s2731_s30, %s2732_s9  }
  0xa2   : > { %p3348_p9 = scmp.ne.s32.totalorder %s3338_s16, 0 }
  0xa3   : > { %s3032_s20 = sand.u32 (!%p3348_p9), 1, %s2712_s26   ;;  %p3349_p0 = scmp.ne.s32.totalorder (!%p3348_p9), %s3335_s14, 0 }
  0xa4   : > { %465 = sbr.rel (%p3348_p9) target bundleno = 1289 (0x509), region = 60  ;;  %s1935_s24 = sshll.u32 (!%p3348_p9), %s3032_s20, 4 }
  0xa5   : > { %s468_s22 = scalar_lea.sflag (!%p3348_p9), [#allocation3], %s3032_s20  ;;  %s3036_s17 = scalar_lea.vmem (!%p3348_p9), [#allocation2], %s1935_s24 }
  0xab   : > { %2683 = dma.done.wait (%p3349_p0), %s468_s22, 256  }
  0xac   : > { %2685 = vsyncadd (%p3349_p0), %s468_s22, 4294967040  ;;  %p3350_p11 = scmp.eq.s32.totalorder %s2831_s29, 0 }
  0xae   : > { %2687 = dma.done.wait (%p3350_p11), [#allocation6], 8960   ;;  %p3351_p4 = pmov %p3350_p11 }
  0xb0   : > { %2689 = vsyncadd (%p3351_p4), [#allocation6], 4294958336  ;;  %p3352_p8 = pmov %p3351_p4 }
  0xb1   : > { %p3353_p6 = pmov %p3351_p4 }
  0xb2   : > { %2691 = dma.done.wait (%p3352_p8), [#allocation9], 3072  }
  0xb3   : > { %2693 = vsyncadd (%p3353_p6), [#allocation9], 4294964224  ;;  %v2733_v0 = vmov 0.0   ;;  %vm2734_vm0 = vmmov 0   ;;  %v2270_v1 = vld [vmem:[#allocation5] sm:$0xff]   ;;  %v2271_v2 = vld [vmem:[#allocation5 + $0x8] sm:$0xff]  }
  0xb4   : > { %2083 = vmatprep.subr.bf16.mxu0 %v2733_v0  ;;  %2095 = vmatprep.mubr.msk.bf16.mxu0 %vm2734_vm0, %v2733_v0  ;;  %v2272_v3 = vld [vmem:[#allocation5 + $0x10] sm:$0xff]   ;;  %v2273_v6 = vld [vmem:[#allocation5 + $0x18] sm:$0xff]   ;;  %v2274_v10 = vld [vmem:[#allocation5 + $0x20] sm:$0xff]   ;;  %vm603_vm1 = vcmask 785408   ;;  %v2735_v42 = vmov 0   ;;  %s3354_s1 = sld [smem:[#allocation26_spill]] }
  0xb5   : > { %2084 = vmatpush3.bf16.msra.mxu0 %v2270_v1  ;;  %v2276_v4 = vld [vmem:[#allocation7 + $0x4] ss:$16 sps:$4 sm:$0xff]   ;;  %v2278_v5 = vld [vmem:[#allocation7] ss:$16 sps:$4 sm:$0xff]   ;;  %v2275_v13 = vld [vmem:[#allocation5 + $0x28] sm:$0xff]   ;;  %897 = vmatprep.mubr.bf16.mxu1 %v2735_v42  ;;  %s3324_s25 = sshll.u32 %s3032_s20, 1 }
  0xb6   : > { %2085 = vmatprep.subr.bf16.mxu0 %v2733_v0  ;;  %865 = vmatprep.subr.bf16.mxu1 %v2276_v4  ;;  %v2282_v7 = vld [vmem:[#allocation7 + $0x24] ss:$16 sps:$4 sm:$0xff]   ;;  %v2284_v8 = vld [vmem:[#allocation7 + $0x20] ss:$16 sps:$4 sm:$0xff]   ;;  %v546_v15 = vld [vmem:[%s3036_s17 + $0x8] sm:$0xff]  ;;  %vm1549_vm2 = vcmask 1041409  }
  0xb7   : > { %866 = vmatpush1.bf16.msra.mxu1 %v2278_v5  ;;  %v2288_v9 = vld [vmem:[#allocation7 + $0x44] ss:$16 sps:$4 sm:$0xff]   ;;  %v2290_v11 = vld [vmem:[#allocation7 + $0x40] ss:$16 sps:$4 sm:$0xff]   ;;  %v2281_v17 = vld [vmem:[#allocation7 + $0xc] ss:$16 sps:$4 sm:$0xff]  }
  0xb8   : > { %867 = vmatprep.subr.bf16.mxu1 %v2282_v7  ;;  %v2294_v12 = vld [vmem:[#allocation7 + $0x64] ss:$16 sps:$4 sm:$0xff]   ;;  %v2296_v16 = vld [vmem:[#allocation7 + $0x60] ss:$16 sps:$4 sm:$0xff]   ;;  %v2279_v20 = vld [vmem:[#allocation7 + $0x8] ss:$16 sps:$4 sm:$0xff]  }
  0xb9   : > { %2086 = vmatpush3.bf16.msra.mxu0 %v2271_v2  ;;  %v545_v14 = vld [vmem:[%s3036_s17] sm:$0xff]  ;;  %v2287_v22 = vld [vmem:[#allocation7 + $0x2c] ss:$16 sps:$4 sm:$0xff]   ;;  %v2285_v24 = vld [vmem:[#allocation7 + $0x28] ss:$16 sps:$4 sm:$0xff]   ;;  %s3146_s23 = scalar_lea.vmem [#allocation11], %s3324_s25 }
  0xba   : > { %2087 = vmatprep.subr.bf16.mxu0 %v2733_v0  ;;  %v2300_v18 = vld [vmem:[#allocation7 + $0x84] ss:$16 sps:$4 sm:$0xff]   ;;  %v559_v19 = vpack.c.bf16 %v546_v15, %v545_v14  ;;  %v2302_v21 = vld [vmem:[#allocation7 + $0x80] ss:$16 sps:$4 sm:$0xff]   ;;  %v2293_v25 = vld [vmem:[#allocation7 + $0x4c] ss:$16 sps:$4 sm:$0xff]  }
  0xbb   : > { %868 = vmatpush1.bf16.msra.mxu1 %v2284_v8  ;;  %v2306_v23 = vld [vmem:[#allocation7 + $0xa4] ss:$16 sps:$4 sm:$0xff]   ;;  %v2308_v26 = vld [vmem:[#allocation7 + $0xa0] ss:$16 sps:$4 sm:$0xff]   ;;  %v2291_v28 = vld [vmem:[#allocation7 + $0x48] ss:$16 sps:$4 sm:$0xff]  }
  0xbc   : > { %869 = vmatprep.subr.bf16.mxu1 %v2288_v9  ;;  %v2312_v27 = vld [vmem:[#allocation7 + $0xc4] ss:$16 sps:$4 sm:$0xff]   ;;  %v2314_v29 = vld [vmem:[#allocation7 + $0xc0] ss:$16 sps:$4 sm:$0xff]   ;;  %v2299_v30 = vld [vmem:[#allocation7 + $0x6c] ss:$16 sps:$4 sm:$0xff]  }
  0xbd   : > { %2088 = vmatpush3.bf16.msra.mxu0 %v2272_v3  ;;  %v2297_v31 = vld [vmem:[#allocation7 + $0x68] ss:$16 sps:$4 sm:$0xff]   ;;  %v2305_v32 = vld [vmem:[#allocation7 + $0x8c] ss:$16 sps:$4 sm:$0xff]   ;;  %v2318_v38 = vld [vmem:[#allocation7 + $0xe4] ss:$16 sps:$4 sm:$0xff]  }
  0xbe   : > { %2089 = vmatprep.subr.bf16.mxu0 %v2733_v0  ;;  %v2303_v33 = vld [vmem:[#allocation7 + $0x88] ss:$16 sps:$4 sm:$0xff]   ;;  %v2311_v34 = vld [vmem:[#allocation7 + $0xac] ss:$16 sps:$4 sm:$0xff]   ;;  %v2320_v39 = vld [vmem:[#allocation7 + $0xe0] ss:$16 sps:$4 sm:$0xff]  }
  0xbf   : > { %870 = vmatpush1.bf16.msra.mxu1 %v2290_v11  ;;  %v2309_v35 = vld [vmem:[#allocation7 + $0xa8] ss:$16 sps:$4 sm:$0xff]   ;;  %v2317_v36 = vld [vmem:[#allocation7 + $0xcc] ss:$16 sps:$4 sm:$0xff]   ;;  %v1942_v43 = vld [vmem:[%s3301_s3] ss:$0 sm:$0xff] }
  0xc0   : > { %871 = vmatprep.subr.bf16.mxu1 %v2294_v12  ;;  %v2315_v37 = vld [vmem:[#allocation7 + $0xc8] ss:$16 sps:$4 sm:$0xff]   ;;  %v2323_v40 = vld [vmem:[#allocation7 + $0xec] ss:$16 sps:$4 sm:$0xff]   ;;  %v2324_v50 = vld [vmem:[#allocation8] sm:$0xff]   ;;  %s529_s19 = scalar_lea.vmem [#allocation12], %s3032_s20 }
  0xc1   : > { %2090 = vmatpush3.bf16.msra.mxu0 %v2273_v6  ;;  %v2321_v41 = vld [vmem:[#allocation7 + $0xe8] ss:$16 sps:$4 sm:$0xff]   ;;  %v2326_v53 = vld [vmem:[#allocation8 + $0x10] sm:$0xff]   ;;  %v2328_v55 = vld [vmem:[#allocation8 + $0x20] sm:$0xff]   ;;  %s1670_s30 = sand.u32 1, %s2831_s29   ;;  %s3323_s9 = sshll.u32 %s2831_s29, 4 }
  0xc2   : > { %2091 = vmatprep.subr.bf16.mxu0 %v2733_v0  ;;  %v2325_v52 = vld [vmem:[#allocation8 + $0x8] sm:$0xff]   ;;  %v2327_v54 = vld [vmem:[#allocation8 + $0x18] sm:$0xff]   ;;  %v2330_v57 = vld [vmem:[#allocation8 + $0x30] sm:$0xff]   ;;  %s3157_s17 = scalar_lea.hbm %s3309_s11, %s3323_s9  ;;  %s1705_s14 = sshll.u32 %s529_s19, 4  ;;  %s1706_s14 = int_to_ptr.vmem [resolvable:$true] %s1705_s14 }
  0xc3   : > { %872 = vmatpush1.bf16.msra.mxu1 %v2296_v16  ;;  %v2329_v56 = vld [vmem:[#allocation8 + $0x28] sm:$0xff]   ;;  %v2331_v58 = vld [vmem:[#allocation8 + $0x38] sm:$0xff]   ;;  %v3081_v59 = vld [vmem:[%s3354_s1] ss:$0 sm:$0xff]  ;;  %s3159_s16 = scalar_lea.sflag [#allocation13], %s1670_s30  ;;  %s2554_s18 = scalar_lea.vmem %s1706_s14, 16 }
  0xc4   : > { %873 = vmatprep.subr.bf16.mxu1 %v2300_v18  ;;  %v953_v60 = vpack.c.bf16 %v3081_v59, %v3081_v59  ;;  %v2334_v61 = vld [vmem:[#allocation7 + $0x104] ss:$16 sps:$4 sm:$0xff]   ;;  %v2332_v62 = vld [vmem:[#allocation7 + $0x100] ss:$16 sps:$4 sm:$0xff]   ;;  %v2337_v63 = vld [vmem:[#allocation7 + $0x10c] ss:$16 sps:$4 sm:$0xff]   ;;  %p2555_p3 = scmp.ne.s32.totalorder %s1706_s14, %s2554_s18 }
  0xc5   : > { %2092 = vmatpush3.bf16.msra.mxu0 %v2274_v10  ;;  %v2335_v1 = vld [vmem:[#allocation7 + $0x108] ss:$16 sps:$4 sm:$0xff]   ;;  %v2340_v2 = vld [vmem:[#allocation7 + $0x124] ss:$16 sps:$4 sm:$0xff]   ;;  %v2338_v3 = vld [vmem:[#allocation7 + $0x120] ss:$16 sps:$4 sm:$0xff]  }
  0xc6   : > { %2093 = vmatprep.subr.bf16.mxu0 %v2733_v0  ;;  %v2343_v4 = vld [vmem:[#allocation7 + $0x12c] ss:$16 sps:$4 sm:$0xff]   ;;  %v2341_v5 = vld [vmem:[#allocation7 + $0x128] ss:$16 sps:$4 sm:$0xff]   ;;  %v2346_v6 = vld [vmem:[#allocation7 + $0x144] ss:$16 sps:$4 sm:$0xff]   ;;  %p2556_p5 = pnand %p2555_p3, %p2980_p10 }
  0xc7   : > { %874 = vmatpush1.bf16.msra.mxu1 %v2302_v21  ;;  %v2344_v7 = vld [vmem:[#allocation7 + $0x140] ss:$16 sps:$4 sm:$0xff]   ;;  %v2349_v8 = vld [vmem:[#allocation7 + $0x14c] ss:$16 sps:$4 sm:$0xff]   ;;  %v2347_v9 = vld [vmem:[#allocation7 + $0x148] ss:$16 sps:$4 sm:$0xff]  }
  0xc8   : > { %875 = vmatprep.subr.bf16.mxu1 %v2306_v23  ;;  %v2350_v10 = vld [vmem:[#allocation7 + $0x160] ss:$16 sps:$4 sm:$0xff]   ;;  %v2352_v11 = vld [vmem:[#allocation7 + $0x164] ss:$16 sps:$4 sm:$0xff]   ;;  %v2353_v12 = vld [vmem:[#allocation7 + $0x168] ss:$16 sps:$4 sm:$0xff]   ;;  %p2557_p7 = pneg %p2556_p5 }
  0xc9   : > { %2094 = vmatpush3.bf16.msra.mxu0 %v2275_v13  ;;  %v2355_v13 = vld [vmem:[#allocation7 + $0x16c] ss:$16 sps:$4 sm:$0xff]   ;;  %v2358_v14 = vld [vmem:[#allocation7 + $0x184] ss:$16 sps:$4 sm:$0xff]   ;;  %v2356_v16 = vld [vmem:[#allocation7 + $0x180] ss:$16 sps:$4 sm:$0xff]  }
  0xca   : > { %908 = vmatprep.subr.bf16.mxu0 %v2281_v17  ;;  %v2361_v15 = vld [vmem:[#allocation7 + $0x18c] ss:$16 sps:$4 sm:$0xff]   ;;  %v2359_v17 = vld [vmem:[#allocation7 + $0x188] ss:$16 sps:$4 sm:$0xff]   ;;  %v2364_v18 = vld [vmem:[#allocation7 + $0x1a4] ss:$16 sps:$4 sm:$0xff]  }
  0xcb   : > { %876 = vmatpush1.bf16.msra.mxu1 %v2308_v26  ;;  %v2365_v21 = vld [vmem:[#allocation7 + $0x1a8] ss:$16 sps:$4 sm:$0xff]   ;;  %v2373_v23 = vld [vmem:[#allocation7 + $0x1cc] ss:$16 sps:$4 sm:$0xff]   ;;  %v2376_v26 = vld [vmem:[#allocation7 + $0x1e4] ss:$16 sps:$4 sm:$0xff]  }
  0xcc   : > { %2096 = vmatmul.mubr.msk.bf16.vlgmr.msra.gmra.mrb[0].mxu0 %vm603_vm1, %v559_v19  ;;  %877 = vmatprep.subr.bf16.mxu1 %v2312_v27  ;;  %v2367_v19 = vld [vmem:[#allocation7 + $0x1ac] ss:$16 sps:$4 sm:$0xff]   ;;  %s2736_s21 = smov [#allocation12]  }
  0xcd   : > { %909 = vmatpush1.bf16.msra.mxu0 %v2279_v20  ;;  %940 = vmatprep.mubr.bf16.mxu0 %v2735_v42  ;;  %v2362_v20 = vld [vmem:[#allocation7 + $0x1a0] ss:$16 sps:$4 sm:$0xff]   ;;  %v2379_v27 = vld [vmem:[#allocation7 + $0x1ec] ss:$16 sps:$4 sm:$0xff]   ;;  %s2558_s8 = sshll.u32 %s2736_s21, 4  ;;  %s2559_s8 = int_to_ptr.vmem [resolvable:$false] %s2558_s8 }
  0xce   : > { %910 = vmatprep.subr.bf16.mxu0 %v2287_v22  ;;  %v2370_v22 = vld [vmem:[#allocation7 + $0x1c4] ss:$16 sps:$4 sm:$0xff]   ;;  %s2560_s15 = scalar_lea.vmem %s2559_s8, 32  ;;  %p2561_p12 = scmp.lt.s32.totalorder %s1706_s14, %s2559_s8 }
  0xcf   : > { %878 = vmatpush1.bf16.msra.mxu1 %v2314_v29  ;;  %v2377_v29 = vld [vmem:[#allocation7 + $0x1e8] ss:$16 sps:$4 sm:$0xff]   ;;  %p2562_p1 = scmp.lt.s32.totalorder %s2560_s15, %s2554_s18 }
  0xd0   : > { %879 = vmatprep.subr.bf16.mxu1 %v2318_v38 }
  0xd1   : > { %911 = vmatpush1.bf16.msra.mxu0 %v2285_v24  ;;  %v2368_v24 = vld [vmem:[#allocation7 + $0x1c0] ss:$16 sps:$4 sm:$0xff]   ;;  %p2563_p2 = por %p2562_p1, %p2561_p12 }
  0xd2   : > { %912 = vmatprep.subr.bf16.mxu0 %v2293_v25  ;;  %v2371_v25 = vld [vmem:[#allocation7 + $0x1c8] ss:$16 sps:$4 sm:$0xff]  }
  0xd3   : > { %880 = vmatpush1.bf16.msra.mxu1 %v2320_v39  ;;  %p2564_p13 = pnand %p2563_p2, %p2557_p7 }
  0xd4   : > { %2099 = vmatprep.subr.bf16.mxu1 %v2733_v0 }
  0xd5   : > { %913 = vmatpush1.bf16.msra.mxu0 %v2291_v28  ;;  %v2374_v28 = vld [vmem:[#allocation7 + $0x1e0] ss:$16 sps:$4 sm:$0xff]  }
  0xd6   : > { %914 = vmatprep.subr.bf16.mxu0 %v2299_v30 }
  0xd9   : > { %915 = vmatpush1.bf16.msra.mxu0 %v2297_v31 }
  0xda   : > { %916 = vmatprep.subr.bf16.mxu0 %v2305_v32 }
  0xdd   : > { %917 = vmatpush1.bf16.msra.mxu0 %v2303_v33 }
  0xde   : > { %918 = vmatprep.subr.bf16.mxu0 %v2311_v34 }
  0xe1   : > { %919 = vmatpush1.bf16.msra.mxu0 %v2309_v35 }
  0xe2   : > { %920 = vmatprep.subr.bf16.mxu0 %v2317_v36 }
  0xe5   : > { %921 = vmatpush1.bf16.msra.mxu0 %v2315_v37 }
  0xe6   : > { %922 = vmatprep.subr.bf16.mxu0 %v2323_v40  ;;  %v1045_v40 = vlaneseq }
  0xe9   : > { %923 = vmatpush1.bf16.msra.mxu0 %v2321_v41  ;;  %v3088_v41 = vshrl.u32 %v1045_v40, 7 }
  0xea   : > { %1294 = vmatprep.subr.bf16.mxu0 %v2334_v61 }
 0x19f   : > { %v641_v44 = vpop.f32.mrb[0].mxu0 }
 0x1a0   : > { %v2097_v45 = vpop.f32.mrb[1].mxu0  ;;  %v3064_v47 = vadd.f32 %v1942_v43, %v641_v44 }
 0x1a1   : > { %v644_v46 = vpop.f32.mrb[2].mxu0 }
 0x1a2   : > { %v3066_v48 = vadd.f32 %v1942_v43, %v644_v46  ;;  %v2098_v49 = vpop.f32.mrb[3].mxu0  ;;  %v3094_v43 = vld [vmem:[%s3304_s6] sm:$0xf] }
 0x1a4   : > { %v704_v51 = vpack.c.bf16 %v3066_v48, %v3064_v47 }
 0x1a6   : > { %898 = vmatmul.mubr.bf16.vlgmr.msra.gmra.mrb[0].mxu1 %v704_v51  ;;  %941 = vmatmul.mubr.bf16.vlgmr.msra.gmra.mrb[4].mxu0 %v704_v51 }
 0x1a7   : > { %2100 = vmatpush3.bf16.msra.mxu1 %v2324_v50  ;;  %2115 = vmatprep.mubr.msk.bf16.mxu1 %vm2734_vm0, %v2733_v0 }
 0x1a8   : > { %2101 = vmatprep.subr.bf16.mxu1 %v2733_v0  ;;  %1326 = vmatprep.mubr.bf16.mxu0 %v2735_v42 }
 0x1a9   : > { %1295 = vmatpush1.bf16.msra.mxu0 %v2332_v62 }
 0x1aa   : > { %1296 = vmatprep.subr.bf16.mxu0 %v2340_v2 }
 0x1ab   : > { %2102 = vmatpush3.bf16.msra.mxu1 %v2325_v52 }
 0x1ac   : > { %2103 = vmatprep.subr.bf16.mxu1 %v2733_v0 }
 0x1ad   : > { %1297 = vmatpush1.bf16.msra.mxu0 %v2338_v3 }
 0x1ae   : > { %1298 = vmatprep.subr.bf16.mxu0 %v2346_v6 }
 0x1af   : > { %2104 = vmatpush3.bf16.msra.mxu1 %v2326_v53 }
 0x1b0   : > { %2105 = vmatprep.subr.bf16.mxu1 %v2733_v0 }
 0x1b1   : > { %1299 = vmatpush1.bf16.msra.mxu0 %v2344_v7 }
 0x1b2   : > { %1300 = vmatprep.subr.bf16.mxu0 %v2352_v11 }
 0x1b3   : > { %2106 = vmatpush3.bf16.msra.mxu1 %v2327_v54 }
 0x1b4   : > { %2107 = vmatprep.subr.bf16.mxu1 %v2733_v0 }
 0x1b5   : > { %1301 = vmatpush1.bf16.msra.mxu0 %v2350_v10 }
 0x1b6   : > { %1302 = vmatprep.subr.bf16.mxu0 %v2358_v14 }
 0x1b7   : > { %2108 = vmatpush3.bf16.msra.mxu1 %v2328_v55 }
 0x1b8   : > { %2109 = vmatprep.subr.bf16.mxu1 %v2733_v0 }
 0x1b9   : > { %1303 = vmatpush1.bf16.msra.mxu0 %v2356_v16 }
 0x1ba   : > { %1304 = vmatprep.subr.bf16.mxu0 %v2364_v18 }
 0x1bb   : > { %2110 = vmatpush3.bf16.msra.mxu1 %v2329_v56 }
 0x1bc   : > { %2111 = vmatprep.subr.bf16.mxu1 %v2733_v0 }
 0x1bd   : > { %1305 = vmatpush1.bf16.msra.mxu0 %v2362_v20 }
 0x1be   : > { %1306 = vmatprep.subr.bf16.mxu0 %v2370_v22  ;;  %v2380_v22 = vld [vmem:[#allocation8 + $0x40] sm:$0xff]  }
 0x1bf   : > { %2112 = vmatpush3.bf16.msra.mxu1 %v2330_v57 }
 0x1c0   : > { %2113 = vmatprep.subr.bf16.mxu1 %v2733_v0 }
 0x1c1   : > { %1307 = vmatpush1.bf16.msra.mxu0 %v2368_v24  ;;  %v2381_v24 = vld [vmem:[#allocation8 + $0x48] sm:$0xff]  }
 0x1c2   : > { %1308 = vmatprep.subr.bf16.mxu0 %v2376_v26  ;;  %v2385_v26 = vld [vmem:[#allocation8 + $0x68] sm:$0xff]  }
 0x1c3   : > { %2114 = vmatpush3.bf16.msra.mxu1 %v2331_v58 }
 0x1c4   : > { %1337 = vmatprep.subr.bf16.mxu1 %v2337_v63 }
 0x1c5   : > { %1309 = vmatpush1.bf16.msra.mxu0 %v2374_v28  ;;  %v2387_v28 = vld [vmem:[#allocation8 + $0x78] sm:$0xff]  }
 0x1c6   : > { %2116 = vmatmul.mubr.bf16.vlgmr.msra.gmra.mrb[4].mxu1 %v953_v60  ;;  %2119 = vmatprep.subr.bf16.mxu0 %v2733_v0 }
 0x1c7   : > { %1369 = vmatprep.mubr.bf16.mxu1 %v2735_v42  ;;  %1338 = vmatpush1.bf16.msra.mxu1 %v2335_v1  ;;  %v1047_v42 = vsub.s32 0, %v3088_v41 }
 0x1c8   : > { %1339 = vmatprep.subr.bf16.mxu1 %v2343_v4 }
 0x1c9   : > { %v1048_v44 = vrot.slane %v3094_v43, %v1047_v42 }
 0x1cb   : > { %1340 = vmatpush1.bf16.msra.mxu1 %v2341_v5 }
 0x1cc   : > { %1341 = vmatprep.subr.bf16.mxu1 %v2349_v8 }
 0x1cf   : > { %1342 = vmatpush1.bf16.msra.mxu1 %v2347_v9  ;;  %v1075_v9 = vsub.s32 1, %v3088_v41 }
 0x1d0   : > { %1343 = vmatprep.subr.bf16.mxu1 %v2355_v13 }
 0x1d1   : > { %v1076_v10 = vrot.slane %v3094_v43, %v1075_v9 }
 0x1d3   : > { %1344 = vmatpush1.bf16.msra.mxu1 %v2353_v12 }
 0x1d4   : > { %1345 = vmatprep.subr.bf16.mxu1 %v2361_v15 }
 0x1d7   : > { %1346 = vmatpush1.bf16.msra.mxu1 %v2359_v17 }
 0x1d8   : > { %1347 = vmatprep.subr.bf16.mxu1 %v2367_v19 }
 0x1db   : > { %1348 = vmatpush1.bf16.msra.mxu1 %v2365_v21 }
 0x1dc   : > { %1349 = vmatprep.subr.bf16.mxu1 %v2373_v23 }
 0x1df   : > { %1350 = vmatpush1.bf16.msra.mxu1 %v2371_v25  ;;  %v2384_v25 = vld [vmem:[#allocation8 + $0x60] sm:$0xff]  }
 0x1e0   : > { %1351 = vmatprep.subr.bf16.mxu1 %v2379_v27  ;;  %v2386_v27 = vld [vmem:[#allocation8 + $0x70] sm:$0xff]  }
 0x1e3   : > { %1352 = vmatpush1.bf16.msra.mxu1 %v2377_v29 }
 0x1e4   : > { %2139 = vmatprep.subr.bf16.mxu1 %v2733_v0 }
 0x279   : > { %v899_v30 = vpop.f32.mrb[0].mxu1  ;;  %v942_v31 = vpop.f32.mrb[4].mxu0 }
 0x27a   : > { %v901_v32 = vpop.f32.mrb[1].mxu1  ;;  %v944_v33 = vpop.f32.mrb[5].mxu0 }
 0x27b   : > { %v903_v34 = vpop.f32.mrb[2].mxu1  ;;  %v946_v35 = vpop.f32.mrb[6].mxu0 }
 0x27c   : > { %v952_v36 = vadd.f32 %v903_v34, %v901_v32  ;;  %v905_v37 = vpop.f32.mrb[3].mxu1  ;;  %v948_v38 = vpop.f32.mrb[7].mxu0  ;;  %v2390_v32 = vld [vmem:[#allocation10 + $0x10] sm:$0xff]   ;;  %v2392_v34 = vld [vmem:[#allocation10 + $0x20] sm:$0xff]  }
 0x27d   : > { %v951_v39 = vadd.f32 %v905_v37, %v899_v30  ;;  %v2388_v30 = vld [vmem:[#allocation10] sm:$0xff]   ;;  %v2395_v37 = vld [vmem:[#allocation10 + $0x38] sm:$0xff]  }
 0x299   : > { %v1036_v45 = vpop.f32.mrb[4].mxu1 }
 0x29a   : > { %v1043_v46 = vadd.f32 %v1036_v45, %v951_v39  ;;  %v2117_v49 = vpop.f32.mrb[5].mxu1 }
 0x29b   : > { %v1039_v50 = vpop.f32.mrb[6].mxu1 }
 0x29c   : > { %v1049_v51 = vadd.f32 %v1048_v44, %v1043_v46  ;;  %v1044_v52 = vadd.f32 %v1039_v50, %v952_v36  ;;  %v2118_v53 = vpop.f32.mrb[7].mxu1  ;;  %v2394_v36 = vld [vmem:[#allocation10 + $0x30] sm:$0xff]  }
 0x29e   : > { %v1051_v54 = vmax.f32 %v1049_v51, 0.0  ;;  %v1050_v55 = vadd.f32 %v1048_v44, %v1044_v52  ;;  %v1476_v52 = vsub.s32 2, %v3088_v41 }
 0x2a0   : > { %v3098_v56 = vadd.f32 %v3081_v59, %v1051_v54  ;;  %v1052_v57 = vmax.f32 %v1050_v55, 0.0  ;;  %v1477_v53 = vrot.slane %v3094_v43, %v1476_v52 }
 0x2a2   : > { %v1055_v58 = vsub.f32 0.0, %v3098_v56  ;;  %v3102_v60 = vadd.f32 %v3081_v59, %v1052_v57 }
 0x2a4   : > { %v1057_v61 = vmul.f32 1.442695, %v1055_v58  ;;  %v1056_v62 = vsub.f32 0.0, %v3102_v60  ;;  %v1382_v29 = vpack.c.bf16 %v3102_v60, %v3098_v56 }
 0x2a6   : > { %2396 = vpow2.f32 %v1057_v61  ;;  %v1059_v63 = vmul.f32 1.442695, %v1056_v62 }
 0x2a8   : > { %2398 = vpow2.f32 %v1059_v63 }
 0x2b0   : > { %v2397_v1 = vpop.eup %2396 }
 0x2b1   : > { %v1061_v2 = vadd.f32 1.0, %v2397_v1 }
 0x2b2   : > { %v2399_v3 = vpop.eup %2398 }
 0x2b3   : > { %v1063_v4 = vmul.f32 1e-06, %v1061_v2  ;;  %v1062_v5 = vadd.f32 1.0, %v2399_v3 }
 0x2b5   : > { %v1065_v6 = vadd.f32 1.0, %v1063_v4  ;;  %v1064_v7 = vmul.f32 1e-06, %v1062_v5 }
 0x2b7   : > { %2400 = vrcp.f32 %v1065_v6  ;;  %v1066_v8 = vadd.f32 1.0, %v1064_v7 }
 0x2b9   : > { %2402 = vrcp.f32 %v1066_v8 }
 0x2c1   : > { %v2401_v59 = vpop.eup %2400 }
 0x2c2   : > { %v1069_v11 = vmul.f32 %v2401_v59, %v944_v33  ;;  %v2391_v33 = vld [vmem:[#allocation10 + $0x18] sm:$0xff]  }
 0x2c3   : > { %v2403_v12 = vpop.eup %2402 }
 0x2c4   : > { %v1070_v13 = vmul.f32 %v2403_v12, %v948_v38  ;;  %v1072_v14 = vadd.f32 %v1069_v11, %v946_v35  ;;  %v2393_v35 = vld [vmem:[#allocation10 + $0x28] sm:$0xff]  }
 0x2c6   : > { %v1071_v15 = vadd.f32 %v1070_v13, %v942_v31  ;;  %v1078_v16 = vadd.f32 %v1076_v10, %v1072_v14  ;;  %v2389_v31 = vld [vmem:[#allocation10 + $0x8] sm:$0xff]  }
 0x2c8   : > { %v1077_v17 = vadd.f32 %v1076_v10, %v1071_v15  ;;  %v1080_v18 = vmax.f32 %v1078_v16, 0.0 }
 0x2ca   : > { %v1079_v19 = vmax.f32 %v1077_v17, 0.0  ;;  %v3111_v21 = vadd.f32 %v1080_v18, %v3066_v48  ;;  %v2383_v48 = vld [vmem:[#allocation8 + $0x58] sm:$0xff]  }
 0x2cc   : > { %v3108_v20 = vadd.f32 %v1079_v19, %v3064_v47  ;;  %v2382_v47 = vld [vmem:[#allocation8 + $0x50] sm:$0xff]  }
 0x2ce   : > { %v1133_v23 = vpack.c.bf16 %v3111_v21, %v3108_v20 }
 0x2d0   : > { %1327 = vmatmul.mubr.bf16.vlgmr.msra.gmra.mrb[8].mxu0 %v1133_v23  ;;  %1370 = vmatmul.mubr.bf16.vlgmr.msra.gmra.mrb[8].mxu1 %v1133_v23 }
 0x2d1   : > { %2120 = vmatpush3.bf16.msra.mxu0 %v2380_v22  ;;  %2135 = vmatprep.mubr.msk.bf16.mxu0 %vm2734_vm0, %v2733_v0 }
 0x2d2   : > { %2121 = vmatprep.subr.bf16.mxu0 %v2733_v0  ;;  %2155 = vmatprep.mubr.msk.bf16.mxu1 %vm2734_vm0, %v2733_v0 }
 0x2d3   : > { %2140 = vmatpush3.bf16.msra.mxu1 %v2388_v30 }
 0x2d4   : > { %2141 = vmatprep.subr.bf16.mxu1 %v2733_v0 }
 0x2d5   : > { %2122 = vmatpush3.bf16.msra.mxu0 %v2381_v24 }
 0x2d6   : > { %2123 = vmatprep.subr.bf16.mxu0 %v2733_v0 }
 0x2d7   : > { %2142 = vmatpush3.bf16.msra.mxu1 %v2389_v31 }
 0x2d8   : > { %2143 = vmatprep.subr.bf16.mxu1 %v2733_v0 }
 0x2d9   : > { %2124 = vmatpush3.bf16.msra.mxu0 %v2382_v47 }
 0x2da   : > { %2125 = vmatprep.subr.bf16.mxu0 %v2733_v0 }
 0x2db   : > { %2144 = vmatpush3.bf16.msra.mxu1 %v2390_v32 }
 0x2dc   : > { %2145 = vmatprep.subr.bf16.mxu1 %v2733_v0 }
 0x2dd   : > { %2126 = vmatpush3.bf16.msra.mxu0 %v2383_v48 }
 0x2de   : > { %2127 = vmatprep.subr.bf16.mxu0 %v2733_v0 }
 0x2df   : > { %2146 = vmatpush3.bf16.msra.mxu1 %v2391_v33 }
 0x2e0   : > { %2147 = vmatprep.subr.bf16.mxu1 %v2733_v0 }
 0x2e1   : > { %2128 = vmatpush3.bf16.msra.mxu0 %v2384_v25 }
 0x2e2   : > { %2129 = vmatprep.subr.bf16.mxu0 %v2733_v0 }
 0x2e3   : > { %2148 = vmatpush3.bf16.msra.mxu1 %v2392_v34 }
 0x2e4   : > { %2149 = vmatprep.subr.bf16.mxu1 %v2733_v0 }
 0x2e5   : > { %2130 = vmatpush3.bf16.msra.mxu0 %v2385_v26 }
 0x2e6   : > { %2131 = vmatprep.subr.bf16.mxu0 %v2733_v0 }
 0x2e7   : > { %2150 = vmatpush3.bf16.msra.mxu1 %v2393_v35 }
 0x2e8   : > { %2151 = vmatprep.subr.bf16.mxu1 %v2733_v0 }
 0x2e9   : > { %2132 = vmatpush3.bf16.msra.mxu0 %v2386_v27 }
 0x2ea   : > { %2133 = vmatprep.subr.bf16.mxu0 %v2733_v0 }
 0x2eb   : > { %2152 = vmatpush3.bf16.msra.mxu1 %v2394_v36 }
 0x2ec   : > { %2153 = vmatprep.subr.bf16.mxu1 %v2733_v0 }
 0x2ed   : > { %2134 = vmatpush3.bf16.msra.mxu0 %v2387_v28 }
 0x2ef   : > { %2154 = vmatpush3.bf16.msra.mxu1 %v2395_v37 }
 0x2f0   : > { %2136 = vmatmul.mubr.bf16.vlgmr.msra.gmra.mrb[12].mxu0 %v1382_v29 }
 0x3a3   : > { %v1328_v38 = vpop.f32.mrb[8].mxu0  ;;  %v1371_v39 = vpop.f32.mrb[8].mxu1 }
 0x3a4   : > { %v1330_v40 = vpop.f32.mrb[9].mxu0  ;;  %v1373_v42 = vpop.f32.mrb[9].mxu1 }
 0x3a5   : > { %v1332_v44 = vpop.f32.mrb[10].mxu0  ;;  %v1375_v45 = vpop.f32.mrb[10].mxu1 }
 0x3a6   : > { %v1381_v46 = vadd.f32 %v1332_v44, %v1330_v40  ;;  %v1334_v49 = vpop.f32.mrb[11].mxu0  ;;  %v1377_v50 = vpop.f32.mrb[11].mxu1 }
 0x3a7   : > { %v1380_v51 = vadd.f32 %v1334_v49, %v1328_v38 }
 0x3c3   : > { %v1465_v54 = vpop.f32.mrb[12].mxu0 }
 0x3c4   : > { %v1472_v55 = vadd.f32 %v1465_v54, %v1380_v51  ;;  %v2137_v57 = vpop.f32.mrb[13].mxu0 }
 0x3c5   : > { %v1468_v58 = vpop.f32.mrb[14].mxu0 }
 0x3c6   : > { %v1478_v0 = vadd.f32 %v1477_v53, %v1472_v55  ;;  %v1473_v61 = vadd.f32 %v1468_v58, %v1381_v46  ;;  %v2138_v62 = vpop.f32.mrb[15].mxu0 }
 0x3c8   : > { %v1480_v63 = vmax.f32 %v1478_v0, 0.0  ;;  %v1479_v1 = vadd.f32 %v1477_v53, %v1473_v61 }
 0x3ca   : > { %v1482_v2 = vadd.f32 %v1480_v63, %v3098_v56  ;;  %v1481_v3 = vmax.f32 %v1479_v1, 0.0  ;;  %v1504_v56 = vsub.s32 3, %v3088_v41 }
 0x3cc   : > { %v1484_v4 = vsub.f32 0.0, %v1482_v2  ;;  %v1483_v5 = vadd.f32 %v1481_v3, %v3102_v60  ;;  %v1505_v60 = vrot.slane %v3094_v43, %v1504_v56 }
 0x3ce   : > { %v1486_v6 = vmul.f32 1.442695, %v1484_v4  ;;  %v1485_v7 = vsub.f32 0.0, %v1483_v5 }
 0x3d0   : > { %2404 = vpow2.f32 %v1486_v6  ;;  %v1488_v8 = vmul.f32 1.442695, %v1485_v7 }
 0x3d2   : > { %2406 = vpow2.f32 %v1488_v8 }
 0x3da   : > { %v2405_v9 = vpop.eup %2404 }
 0x3db   : > { %v1490_v59 = vadd.f32 1.0, %v2405_v9 }
 0x3dc   : > { %v2407_v10 = vpop.eup %2406 }
 0x3dd   : > { %v1492_v11 = vmul.f32 1e-06, %v1490_v59  ;;  %v1491_v12 = vadd.f32 1.0, %v2407_v10 }
 0x3df   : > { %v1494_v13 = vadd.f32 1.0, %v1492_v11  ;;  %v1493_v14 = vmul.f32 1e-06, %v1491_v12 }
 0x3e1   : > { %2408 = vrcp.f32 %v1494_v13  ;;  %v1495_v15 = vadd.f32 1.0, %v1493_v14 }
 0x3e3   : > { %2410 = vrcp.f32 %v1495_v15 }
 0x3eb   : > { %v2409_v16 = vpop.eup %2408 }
 0x3ec   : > { %v1498_v17 = vmul.f32 %v2409_v16, %v1373_v42 }
 0x3ed   : > { %v2411_v18 = vpop.eup %2410 }
 0x3ee   : > { %v1501_v19 = vadd.f32 %v1498_v17, %v1375_v45  ;;  %v1499_v22 = vmul.f32 %v2411_v18, %v1377_v50 }
 0x3f0   : > { %v1507_v23 = vadd.f32 %v1505_v60, %v1501_v19  ;;  %v1500_v24 = vadd.f32 %v1499_v22, %v1371_v39 }
 0x3f2   : > { %v1506_v47 = vadd.f32 %v1505_v60, %v1500_v24  ;;  %v1509_v48 = vmax.f32 %v1507_v23, 0.0 }
 0x3f4   : > { %v1508_v25 = vmax.f32 %v1506_v47, 0.0  ;;  %v1511_v26 = vadd.f32 %v1509_v48, %v3111_v21 }
 0x3f6   : > { %v1510_v27 = vadd.f32 %v1508_v25, %v3108_v20  ;;  %v1518_v28 = vrot.slane %v1511_v26, 4 }
 0x3f8   : > { %v1512_v29 = vrot.slane %v1510_v27, 4  ;;  %v1519_v41 = vadd.f32 %v1518_v28, %v1511_v26 }
 0x3fa   : > { %v1513_v30 = vadd.f32 %v1512_v29, %v1510_v27  ;;  %v1520_v31 = vrot.slane %v1519_v41, 2 }
 0x3fc   : > { %v1514_v43 = vrot.slane %v1513_v30, 2  ;;  %v1521_v32 = vadd.f32 %v1520_v31, %v1519_v41 }
 0x3fe   : > { %v1515_v33 = vadd.f32 %v1514_v43, %v1513_v30  ;;  %v1522_v34 = vrot.slane %v1521_v32, 1 }
 0x400   : > { %v1516_v35 = vrot.slane %v1515_v33, 1  ;;  %v1523_v36 = vadd.f32 %v1522_v34, %v1521_v32 }
 0x402   : > { %v1517_v37 = vadd.f32 %v1516_v35, %v1515_v33  ;;  %v1526_v38 = vmul.f32 0.125, %v1523_v36 }
 0x404   : > { %v1525_v21 = vmul.f32 0.125, %v1517_v37  ;;  %v1544_v20 = vpack.c.bf16 %v1526_v38, %v1526_v38 }
 0x406   : > { %v1543_v39 = vpack.c.bf16 %v1525_v21, %v1525_v21  ;;  %v1646_v40 = vadd.f32 %v1526_v38, %v1525_v21  ;;  %v1643_v42 = vsel %vm1549_vm2, %v1526_v38, %v1525_v21  ;;  %v1548_v45 = vunpack.c.l.b16 %v1544_v20 }
 0x407   : > { %1645 = vst [vmem:[%s3146_s23] sm:$0x3] %v1643_v42 }
 0x408   : > { %v1547_v44 = vunpack.c.l.b16 %v1543_v39  ;;  %v1647_v46 = vmul.f32 0.5, %v1646_v40 }
 0x40a   : > { %v1550_v49 = vsel %vm1549_vm2, %v1548_v45, %v1547_v44  ;;  %1648 = vst [vmem:[%s529_s19] sm:$0x1] %v1647_v46 }
 0x40b   : > { %v1551_v50 = vpack.c.b16 %v1550_v49, %v1550_v49 }
 0x40d   : > { %2156 = vmatmul.mubr.bf16.vlgmr.msra.gmra.mrb[12].mxu1 %v1551_v50 }
 0x40e   : > { %2567 = shalt.err (!%p2564_p13)
}
 0x40f   : > { %s2568_s19 = scalar_lea.hbm %s3157_s17, 16  ;;  %s2572_s22 = scalar_lea.hbm %s3309_s11, 32 }
 0x410   : > { %p2569_p9 = scmp.ne.s32.totalorder %s3157_s17, %s2568_s19  ;;  %p2573_p4 = scmp.lt.u32.totalorder %s3157_s17, %s3309_s11 }
 0x411   : > { %p2574_p8 = scmp.lt.u32.totalorder %s2572_s22, %s2568_s19  ;;  %p2576_p3 = scmp.lt.u32.totalorder %s2568_s19, %s3157_s17 }
 0x412   : > { %p2570_p0 = pnand %p2569_p9, %p2980_p10 }
 0x413   : > { %p2575_p6 = por %p2574_p8, %p2573_p4 }
 0x414   : > { %p2571_p11 = pneg %p2570_p0 }
 0x415   : > { %p2577_p5 = por %p2576_p3, %p2575_p6 }
 0x417   : > { %p2578_p7 = pnand %p2577_p5, %p2571_p11 }
 0x419   : > { %2581 = shalt.err (!%p2578_p7)
}
 0x41a   : > { %2178 = dma.vmem_to_hbm [thread:$0]  (%p2980_p10), %s1706_s14, 16, %s3157_s17, %s3159_s16  }
 0x41b   : > { %s2042_s18 = sshll.u32 %s2831_s29, 5  ;;  %s1692_s15 = sshll.u32 %s3146_s23, 4  ;;  %s1693_s15 = int_to_ptr.vmem [resolvable:$true] %s1692_s15 }
 0x41c   : > { %s3355_s22 = sld [smem:[#allocation30_spill]]  ;;  %s1666_s21 = scalar_lea.sflag [#allocation4], %s3032_s20 }
 0x41d   : > { %s2582_s8 = scalar_lea.vmem %s1693_s15, 32  ;;  %s2737_s9 = smov [#allocation11]  }
 0x41e   : > { %p2583_p12 = scmp.ne.s32.totalorder %s1693_s15, %s2582_s8  ;;  %s2586_s25 = sshll.u32 %s2737_s9, 4  ;;  %s2587_s25 = int_to_ptr.vmem [resolvable:$false] %s2586_s25 }
 0x41f   : > { %s2588_s0 = scalar_lea.vmem %s2587_s25, 64  ;;  %p2589_p13 = scmp.lt.s32.totalorder %s1693_s15, %s2587_s25 }
 0x420   : > { %p2584_p1 = pnand %p2583_p12, %p2980_p10  ;;  %p2590_p9 = scmp.lt.s32.totalorder %s2588_s0, %s2582_s8 }
 0x422   : > { %s3186_s19 = scalar_lea.hbm %s3355_s22, %s2042_s18  ;;  %p2585_p2 = pneg %p2584_p1 }
 0x423   : > { %p2591_p0 = por %p2590_p9, %p2589_p13 }
 0x425   : > { %p2592_p11 = pnand %p2591_p0, %p2585_p2 }
 0x427   : > { %2595 = shalt.err (!%p2592_p11)
}
 0x428   : > { %s2596_s23 = scalar_lea.hbm %s3186_s19, 32  ;;  %s2600_s9 = scalar_lea.hbm %s3355_s22, 64 }
 0x429   : > { %p2597_p4 = scmp.ne.s32.totalorder %s3186_s19, %s2596_s23  ;;  %p2601_p3 = scmp.lt.u32.totalorder %s3186_s19, %s3355_s22 }
 0x42a   : > { %p2602_p5 = scmp.lt.u32.totalorder %s2600_s9, %s2596_s23  ;;  %p2604_p12 = scmp.lt.u32.totalorder %s2596_s23, %s3186_s19 }
 0x42b   : > { %p2598_p8 = pnand %p2597_p4, %p2980_p10 }
 0x42c   : > { %p2603_p7 = por %p2602_p5, %p2601_p3 }
 0x42d   : > { %p2599_p6 = pneg %p2598_p8 }
 0x42e   : > { %p2605_p1 = por %p2604_p12, %p2603_p7 }
 0x430   : > { %p2606_p2 = pnand %p2605_p1, %p2599_p6 }
 0x432   : > { %2609 = shalt.err (!%p2606_p2)
}
 0x433   : > { %2177 = dma.vmem_to_hbm [thread:$0]  (%p2980_p10), %s1693_s15, 32, %s3186_s19, %s1666_s21  }
 0x434   : > { %s3356_s8 = sld [smem:[#allocation28_spill]]  ;;  %s3357_s17 = sshll.u32 %s3032_s20, 1 }
 0x435   : > { %s542_s14 = scalar_lea.vmem [#allocation15], %s3357_s17  ;;  %s3358_s25 = sld [smem:[#allocation32_spill]] }
 0x436   : > { %s1731_s9 = sshll.u32 %s542_s14, 4  ;;  %s3360_s21 = sld [smem:[#allocation29_spill]]  ;;  %s3218_s9 = int_to_ptr.vmem [resolvable:$true] %s1731_s9 }
 0x437   : > { %s535_s0 = scalar_lea.vmem [#allocation14], %s3032_s20  ;;  %s2738_s17 = smov [#allocation15]  }
 0x438   : > { %s3226_s24 = sshll.u32 %s535_s0, 4  ;;  %s2614_s23 = sshll.u32 %s2738_s17, 4  ;;  %s2615_s23 = int_to_ptr.vmem [resolvable:$false] %s2614_s23  ;;  %s1719_s24 = int_to_ptr.vmem [resolvable:$true] %s3226_s24 }
 0x439   : > { %s2616_s30 = scalar_lea.vmem %s2615_s23, 64  ;;  %p2617_p11 = scmp.lt.s32.totalorder %s3218_s9, %s2615_s23 }
 0x43a   : > { %v2039_v51 = vld [vmem:[%s3356_s8] ss:$0 sm:$0xff]  ;;  %s1679_s8 = scalar_lea.sflag [#allocation16], %s3032_s20 }
 0x43b   : > { %s3359_s1 = smov %s3358_s25  ;;  %s3216_s2 = scalar_lea.hbm %s3358_s25, %s2042_s18 }
 0x43c   : > { %v1653_v57 = vld [vmem:[%s3360_s21] sm:$0x1]  ;;  %s2610_s18 = scalar_lea.vmem %s3218_s9, 32 }
 0x43d   : > { %p2611_p13 = scmp.ne.s32.totalorder %s3218_s9, %s2610_s18  ;;  %p2618_p4 = scmp.lt.s32.totalorder %s2616_s30, %s2610_s18 }
 0x43f   : > { %p2612_p9 = pnand %p2611_p13, %p2980_p10  ;;  %p2619_p8 = por %p2618_p4, %p2617_p11 }
 0x441   : > { %p2613_p0 = pneg %p2612_p9 }
 0x443   : > { %p2620_p6 = pnand %p2619_p8, %p2613_p0 }
 0x4e0   : > { %v1635_v52 = vpop.f32.mrb[12].mxu1 }
 0x4e1   : > { %v1650_v53 = vrot.slane %v1635_v52, 1  ;;  %v1663_v54 = vadd.f32 %v2039_v51, %v1635_v52  ;;  %v2157_v55 = vpop.f32.mrb[13].mxu1 }
 0x4e2   : > { %v1638_v58 = vpop.f32.mrb[14].mxu1 }
 0x4e3   : > { %v1652_v0 = vadd.f32 %v1650_v53, %v1635_v52  ;;  %v2158_v61 = vpop.f32.mrb[15].mxu1  ;;  %1664 = vst [vmem:[%s542_s14] sm:$0x3] %v1663_v54 }
 0x4e4   : > { %2623 = shalt.err (!%p2620_p6)
}
 0x4e5   : > { %s2624_s14 = scalar_lea.hbm %s3216_s2, 32  ;;  %s2628_s19 = scalar_lea.hbm %s3359_s1, 64 }
 0x4e6   : > { %p2625_p3 = scmp.ne.s32.totalorder %s3216_s2, %s2624_s14  ;;  %p2629_p12 = scmp.lt.u32.totalorder %s3216_s2, %s3359_s1 }
 0x4e7   : > { %p2630_p1 = scmp.lt.u32.totalorder %s2628_s19, %s2624_s14  ;;  %p2632_p13 = scmp.lt.u32.totalorder %s2624_s14, %s3216_s2 }
 0x4e8   : > { %p2626_p5 = pnand %p2625_p3, %p2980_p10 }
 0x4e9   : > { %p2631_p2 = por %p2630_p1, %p2629_p12 }
 0x4ea   : > { %p2627_p7 = pneg %p2626_p5 }
 0x4eb   : > { %p2633_p9 = por %p2632_p13, %p2631_p2 }
 0x4ed   : > { %p2634_p0 = pnand %p2633_p9, %p2627_p7 }
 0x4ef   : > { %2637 = shalt.err (!%p2634_p0)
}
 0x4f0   : > { %2180 = dma.vmem_to_hbm [thread:$0]  (%p2980_p10), %s3218_s9, 32, %s3216_s2, %s1679_s8   ;;  %v1654_v62 = vadd.f32 %v1653_v57, %v1652_v0 }
 0x4f1   : > { %s3361_s18 = sshll.u32 %s2831_s29, 4  ;;  %s3362_s25 = sld [smem:[#allocation31_spill]] }
 0x4f2   : > { %1655 = vst [vmem:[%s535_s0] sm:$0x1] %v1654_v62  ;;  %s2638_s14 = scalar_lea.vmem %s1719_s24, 16  ;;  %s2739_s21 = smov [#allocation14]  }
 0x4f3   : > { %p2639_p11 = scmp.ne.s32.totalorder %s1719_s24, %s2638_s14  ;;  %s2642_s17 = sshll.u32 %s2739_s21, 4  ;;  %s2643_s17 = int_to_ptr.vmem [resolvable:$false] %s2642_s17 }
 0x4f4   : > { %s2644_s1 = scalar_lea.vmem %s2643_s17, 32  ;;  %p2645_p6 = scmp.lt.s32.totalorder %s1719_s24, %s2643_s17 }
 0x4f5   : > { %p2640_p4 = pnand %p2639_p11, %p2980_p10  ;;  %p2646_p3 = scmp.lt.s32.totalorder %s2644_s1, %s2638_s14 }
 0x4f7   : > { %s3363_s15 = smov %s3362_s25  ;;  %s3255_s19 = scalar_lea.hbm %s3362_s25, %s3361_s18 }
 0x4f8   : > { %p2641_p8 = pneg %p2640_p4  ;;  %p2647_p5 = por %p2646_p3, %p2645_p6 }
 0x4fa   : > { %p2648_p7 = pnand %p2647_p5, %p2641_p8 }
 0x4fc   : > { %2651 = shalt.err (!%p2648_p7)
}
 0x4fd   : > { %s2652_s2 = scalar_lea.hbm %s3255_s19, 16  ;;  %s2656_s9 = scalar_lea.hbm %s3363_s15, 32 }
 0x4fe   : > { %p2653_p12 = scmp.ne.s32.totalorder %s3255_s19, %s2652_s2  ;;  %p2657_p13 = scmp.lt.u32.totalorder %s3255_s19, %s3363_s15 }
 0x4ff   : > { %p2658_p9 = scmp.lt.u32.totalorder %s2656_s9, %s2652_s2  ;;  %p2660_p11 = scmp.lt.u32.totalorder %s2652_s2, %s3255_s19 }
 0x500   : > { %p2654_p1 = pnand %p2653_p12, %p2980_p10 }
 0x501   : > { %p2659_p0 = por %p2658_p9, %p2657_p13 }
 0x502   : > { %p2655_p2 = pneg %p2654_p1 }
 0x503   : > { %p2661_p4 = por %p2660_p11, %p2659_p0 }
 0x505   : > { %p2662_p8 = pnand %p2661_p4, %p2655_p2 }
 0x507   : > { %2665 = shalt.err (!%p2662_p8)
}
 0x508   : > { %2179 = dma.vmem_to_hbm [thread:$0]  (%p2980_p10), %s1719_s24, 16, %s3255_s19, %s3159_s16  }
 0x509 PF: > { %s3364_s1 = sld [smem:[#allocation23_spill]]  ;;  %s3365_s18 = sld [smem:[#allocation24_spill]] }
 0x50a   : > { %p3367_p3 = scmp.ge.s32.totalorder %s2720_s28, 2 }
 0x50f   : > { %s1743_s23 = sand.u32 1, %s3364_s1   ;;  %p3366_p6 = scmp.ne.s32.totalorder %s3365_s18, 0 }
 0x510   : > { %s1744_s30 = scalar_lea.sflag [#allocation4], %s1743_s23 }
 0x511   : > { %p2203_p5 = pnand %p3367_p3, %p3366_p6 }
 0x513   : > { %2695 = dma.done.wait (!%p2203_p5), %s1744_s30, 32  }
 0x514   : > { %2697 = vsyncadd (!%p2203_p5), %s1744_s30, 4294967264  ;;  %s3368_s25 = sadd.s32 4294967294, %s2720_s28  }
 0x515   : > { %s1752_s14 = sand.u32 1, %s3368_s25  }
 0x516   : > { %s1753_s21 = scalar_lea.sflag [#allocation13], %s1752_s14 }
 0x517   : > { %2699 = dma.done.wait (!%p2203_p5), %s1753_s21, 32  }
 0x518   : > { %2701 = vsyncadd (!%p2203_p5), %s1753_s21, 4294967264  ;;  %s1769_s10 = scalar_lea.sflag [#allocation16], %s1743_s23 }
 0x519   : > { %2703 = dma.done.wait (!%p2203_p5), %s1769_s10, 32  }
 0x51a   : > { %2705 = vsyncadd (!%p2203_p5), %s1769_s10, 4294967264  ;;  %p35_p10 = scmp.ge.s32.totalorder %s2970_s12, 4   ;;  %s3369_s25 = smov %s2712_s26 }
 0x51b   : > { %s3370_s26 = smov %s2716_s27  ;;  %s3371_s27 = smov %s2986_s13 }
 0x51c   : > { %s3372_s28 = smov %s2970_s12  ;;  %37 = sbr.rel (!%p35_p10) target bundleno = 20 (0x14), region = 172 }
 0x523   :  { %1774 = vsyncpa [#allocation3], 1 }
 0x524   :  { %1776 = vsyncpa [#allocation3 + $0x1], 1 }
 0x525   :  { %1777 = vsyncpa [#allocation6], 1 }
 0x526   :  { %1778 = vsyncpa [#allocation9], 1 }
 0x527   :  { %1779 = vsyncpa [#allocation4], 1 }
 0x528   :  { %1781 = vsyncpa [#allocation4 + $0x1], 1 }
 0x529   :  { %1782 = vsyncpa [#allocation13], 1 }
 0x52a   :  { %1784 = vsyncpa [#allocation13 + $0x1], 1 }
 0x52b   :  { %1785 = vsyncpa [#allocation16], 1 }
 0x52c   :  { %1787 = vsyncpa [#allocation16 + $0x1], 1 }

</bundles_post_ra>
